<compile_context>
chip_gen: v7x
topology: tpu7x:2x2x1
jax: 0.10.0
libtpu: 0.0.40
codegen_flags: <defaults>
</compile_context>

<pallas_src>
import jax
import jax.numpy as jnp
from jax.experimental import pallas as pl
from jax.experimental.pallas import tpu as pltpu

DATA_DIMENSION = 8   # nn.GRU(input_size=DATA_DIMENSION, ...)
NUM_LAYERS = 3
HIDDEN = 1           # hidden_size=1


# ----------------------------------------------------------------------------
# Pallas kernel: wavefront 3-layer GRU recurrence.
#   gi0_ref : (T, 3, B)  precomputed layer-0 input gates (x@W_ih0.T + b_ih0),
#                        time-major, gate-major, batch on lanes      (VMEM)
#   p_ref   : (12, 3, 1) per-layer [w_ih, w_hh, b_ih, b_hh] gate columns
#                        (w_ih / b_ih rows unused for layer 0)       (VMEM)
#   out_ref : (1, B)     final hidden state of the last layer        (VMEM)
# ----------------------------------------------------------------------------
def _gru_kernel(gi0_ref, p_ref, out_ref):
    T, _, B = gi0_ref.shape

    # Hoisted, pre-broadcast parameter vregs (loop-invariant), each (3, B).
    def P(l, j):
        return jnp.broadcast_to(p_ref[4 * l + j], (3, B))

    w_hh0 = P(0, 1); b_hh0 = P(0, 3)
    w_ih1 = P(1, 0); w_hh1 = P(1, 1); b_ih1 = P(1, 2); b_hh1 = P(1, 3)
    w_ih2 = P(2, 0); w_hh2 = P(2, 1); b_ih2 = P(2, 2); b_hh2 = P(2, 3)

    def cell(gi, gh, h):
        # gi, gh: (3, B) pre-activations (rows = r, z, n); h: (1, B).
        rz = jax.nn.sigmoid(gi[0:2] + gh[0:2])     # fused r/z sigmoid (one EUP push)
        r = rz[0:1]
        z = rz[1:2]
        n = jnp.tanh(gi[2:3] + r * gh[2:3])
        return (1.0 - z) * n + z * h               # (1, B)

    def step(i, carry):
        h0, h1, h2 = carry                         # each (1, B)

        # --- layer 0 at t = i (input gates precomputed) ---
        t0 = jnp.minimum(i, T - 1)
        gi_0 = gi0_ref[t0]                         # (3, B)
        gh_0 = h0 * w_hh0 + b_hh0
        h0n = cell(gi_0, gh_0, h0)

        # --- layer 1 at t = i - 1 (input = carried layer-0 output) ---
        gi_1 = h0 * w_ih1 + b_ih1
        gh_1 = h1 * w_hh1 + b_hh1
        h1n = cell(gi_1, gh_1, h1)

        # --- layer 2 at t = i - 2 (input = carried layer-1 output) ---
        gi_2 = h1 * w_ih2 + b_ih2
        gh_2 = h2 * w_hh2 + b_hh2
        h2n = cell(gi_2, gh_2, h2)

        # Wavefront validity masks (prime / drain steps).
        h0 = jnp.where(i < T, h0n, h0)
        h1 = jnp.where(jnp.logical_and(i >= 1, i <= T), h1n, h1)
        h2 = jnp.where(i >= 2, h2n, h2)
        return h0, h1, h2

    z0 = jnp.zeros((1, B), jnp.float32)
    n_steps = T + 2
    unroll = True if n_steps <= 64 else 8
    _, _, h2 = jax.lax.fori_loop(0, n_steps, step, (z0, z0, z0), unroll=unroll)

    out_ref[...] = h2                              # lane-dense (1, B) store


def gru_last_output(x, w_ih_l0, packed_params):
    """x: (B, T, D) batch-first (PyTorch convention). Returns (B,) = y[:, -1, 0]."""
    B, T, D = x.shape
    x32 = x.astype(jnp.float32)
    w0 = w_ih_l0.astype(jnp.float32)               # (3, D)
    p = packed_params.astype(jnp.float32)          # (NUM_LAYERS, 4, 3)

    # Layer-0 input projection for ALL timesteps, done once via XLA (MXU-friendly
    # dense matmul); result laid out time-major, gate-major, batch-on-lanes.
    b_ih0 = p[0, 2]                                # (3,)
    gi0 = jnp.einsum('btd,gd->tgb', x32, w0) + b_ih0[None, :, None]   # (T, 3, B)

    # Parameter gate-columns: (NUM_LAYERS*4, 3, 1).
    pcol = p.reshape(NUM_LAYERS * 4, 3)[:, :, None]

    out = pl.pallas_call(
        _gru_kernel,
        out_shape=jax.ShapeDtypeStruct((1, B), jnp.float32),
        in_specs=[
            pl.BlockSpec(memory_space=pltpu.MemorySpace.VMEM),
            pl.BlockSpec(memory_space=pltpu.MemorySpace.VMEM),
        ],
        out_specs=pl.BlockSpec(memory_space=pltpu.MemorySpace.VMEM),
    )(gi0, pcol)
    return out[0]                                  # (B,)


# ----------------------------------------------------------------------------
# Deterministic parameter init (PyTorch nn.GRU: U(-1/sqrt(H), 1/sqrt(H)) = U(-1,1))
# ----------------------------------------------------------------------------
def init_params(key):
    def u(k, shape):
        return jax.random.uniform(k, shape, jnp.float32, minval=-1.0, maxval=1.0)

    keys = jax.random.split(key, 4 * NUM_LAYERS)
    w_ih_l0 = None
    packed = []
    for l in range(NUM_LAYERS):
        k_wi, k_wh, k_bi, k_bh = keys[4 * l: 4 * l + 4]
        in_size = DATA_DIMENSION if l == 0 else HIDDEN
        w_ih = u(k_wi, (3 * HIDDEN, in_size))      # (3, in_size)
        w_hh = u(k_wh, (3 * HIDDEN, HIDDEN))       # (3, 1)
        b_ih = u(k_bi, (3 * HIDDEN,))
        b_hh = u(k_bh, (3 * HIDDEN,))
        if l == 0:
            w_ih_l0 = w_ih
            w_ih_row = jnp.zeros((3,), jnp.float32)    # unused slot for layer 0
        else:
            w_ih_row = w_ih[:, 0]
        packed.append(jnp.stack([w_ih_row, w_hh[:, 0], b_ih, b_hh], axis=0))
    return w_ih_l0, jnp.stack(packed, axis=0)      # (3, D), (NUM_LAYERS, 4, 3)


# ----------------------------------------------------------------------------
# Pure-JAX reference (same math) for a correctness check.
# ----------------------------------------------------------------------------
def gru_ref(x, w_ih_l0, packed):
    B, T, D = x.shape
    y = x.astype(jnp.float32)
    for l in range(NUM_LAYERS):
        w_ih = w_ih_l0 if l == 0 else packed[l, 0][:, None]
        w_hh = packed[l, 1][:, None]
        b_ih = packed[l, 2]
        b_hh = packed[l, 3]
        h = jnp.zeros((B, 1), jnp.float32)
        outs = []
        for t in range(T):
            xt = y[:, t, :]
            gi = xt @ w_ih.T + b_ih
            gh = h @ w_hh.T + b_hh
            r = jax.nn.sigmoid(gi[:, 0:1] + gh[:, 0:1])
            z = jax.nn.sigmoid(gi[:, 1:2] + gh[:, 1:2])
            n = jnp.tanh(gi[:, 2:3] + r * gh[:, 2:3])
            h = (1.0 - z) * n + z * h
            outs.append(h)
        y = jnp.stack(outs, axis=1)                # (B, T, 1)
    return y[:, -1, 0]


if __name__ == "__main__":
    key = jax.random.PRNGKey(0)
    kx, kp = jax.random.split(key)

    B, T, D = 2, 8, DATA_DIMENSION
    x = jax.random.normal(kx, (B, T, D), jnp.float32)
    w_ih_l0, packed = init_params(kp)

    out = gru_last_output(x, w_ih_l0, packed)
    out = jax.block_until_ready(out)

    ref = gru_ref(x, w_ih_l0, packed)
    assert out.shape == (B,), out.shape
    assert jnp.allclose(out, ref, atol=1e-5, rtol=1e-5), (out, ref)
    print("KERNEL_OK")
</pallas_src>

<mosaic_0001>
module attributes {stable_mosaic.version = 11 : i64} {
  func.func @_gru_kernel(%arg0: memref<8x3x2xf32, #tpu.memory_space<vmem>>, %arg1: memref<12x3x1xf32, #tpu.memory_space<vmem>>, %arg2: memref<1x2xf32, #tpu.memory_space<vmem>>) attributes {dimension_semantics = [], scalar_prefetch = 0 : i64, scratch_operands = 0 : i64, tpu.core_type = #tpu.core_type<tc>} {
    %c1 = arith.constant 1 : index
    %c0 = arith.constant 0 : index
    %c0_0 = arith.constant 0 : index
    %0 = vector.load %arg1[%c1, %c0, %c0_0] : memref<12x3x1xf32, #tpu.memory_space<vmem>>, vector<1x3x1xf32>
    %1 = vector.shape_cast %0 : vector<1x3x1xf32> to vector<3x1xf32>
    %2 = vector.shape_cast %1 : vector<3x1xf32> to vector<3x1xf32>
    %3 = vector.broadcast %2 : vector<3x1xf32> to vector<3x2xf32>
    %c3 = arith.constant 3 : index
    %c0_1 = arith.constant 0 : index
    %c0_2 = arith.constant 0 : index
    %4 = vector.load %arg1[%c3, %c0_1, %c0_2] : memref<12x3x1xf32, #tpu.memory_space<vmem>>, vector<1x3x1xf32>
    %5 = vector.shape_cast %4 : vector<1x3x1xf32> to vector<3x1xf32>
    %6 = vector.shape_cast %5 : vector<3x1xf32> to vector<3x1xf32>
    %7 = vector.broadcast %6 : vector<3x1xf32> to vector<3x2xf32>
    %c4 = arith.constant 4 : index
    %c0_3 = arith.constant 0 : index
    %c0_4 = arith.constant 0 : index
    %8 = vector.load %arg1[%c4, %c0_3, %c0_4] : memref<12x3x1xf32, #tpu.memory_space<vmem>>, vector<1x3x1xf32>
    %9 = vector.shape_cast %8 : vector<1x3x1xf32> to vector<3x1xf32>
    %10 = vector.shape_cast %9 : vector<3x1xf32> to vector<3x1xf32>
    %11 = vector.broadcast %10 : vector<3x1xf32> to vector<3x2xf32>
    %c5 = arith.constant 5 : index
    %c0_5 = arith.constant 0 : index
    %c0_6 = arith.constant 0 : index
    %12 = vector.load %arg1[%c5, %c0_5, %c0_6] : memref<12x3x1xf32, #tpu.memory_space<vmem>>, vector<1x3x1xf32>
    %13 = vector.shape_cast %12 : vector<1x3x1xf32> to vector<3x1xf32>
    %14 = vector.shape_cast %13 : vector<3x1xf32> to vector<3x1xf32>
    %15 = vector.broadcast %14 : vector<3x1xf32> to vector<3x2xf32>
    %c6 = arith.constant 6 : index
    %c0_7 = arith.constant 0 : index
    %c0_8 = arith.constant 0 : index
    %16 = vector.load %arg1[%c6, %c0_7, %c0_8] : memref<12x3x1xf32, #tpu.memory_space<vmem>>, vector<1x3x1xf32>
    %17 = vector.shape_cast %16 : vector<1x3x1xf32> to vector<3x1xf32>
    %18 = vector.shape_cast %17 : vector<3x1xf32> to vector<3x1xf32>
    %19 = vector.broadcast %18 : vector<3x1xf32> to vector<3x2xf32>
    %c7 = arith.constant 7 : index
    %c0_9 = arith.constant 0 : index
    %c0_10 = arith.constant 0 : index
    %20 = vector.load %arg1[%c7, %c0_9, %c0_10] : memref<12x3x1xf32, #tpu.memory_space<vmem>>, vector<1x3x1xf32>
    %21 = vector.shape_cast %20 : vector<1x3x1xf32> to vector<3x1xf32>
    %22 = vector.shape_cast %21 : vector<3x1xf32> to vector<3x1xf32>
    %23 = vector.broadcast %22 : vector<3x1xf32> to vector<3x2xf32>
    %c8 = arith.constant 8 : index
    %c0_11 = arith.constant 0 : index
    %c0_12 = arith.constant 0 : index
    %24 = vector.load %arg1[%c8, %c0_11, %c0_12] : memref<12x3x1xf32, #tpu.memory_space<vmem>>, vector<1x3x1xf32>
    %25 = vector.shape_cast %24 : vector<1x3x1xf32> to vector<3x1xf32>
    %26 = vector.shape_cast %25 : vector<3x1xf32> to vector<3x1xf32>
    %27 = vector.broadcast %26 : vector<3x1xf32> to vector<3x2xf32>
    %c9 = arith.constant 9 : index
    %c0_13 = arith.constant 0 : index
    %c0_14 = arith.constant 0 : index
    %28 = vector.load %arg1[%c9, %c0_13, %c0_14] : memref<12x3x1xf32, #tpu.memory_space<vmem>>, vector<1x3x1xf32>
    %29 = vector.shape_cast %28 : vector<1x3x1xf32> to vector<3x1xf32>
    %30 = vector.shape_cast %29 : vector<3x1xf32> to vector<3x1xf32>
    %31 = vector.broadcast %30 : vector<3x1xf32> to vector<3x2xf32>
    %c10 = arith.constant 10 : index
    %c0_15 = arith.constant 0 : index
    %c0_16 = arith.constant 0 : index
    %32 = vector.load %arg1[%c10, %c0_15, %c0_16] : memref<12x3x1xf32, #tpu.memory_space<vmem>>, vector<1x3x1xf32>
    %33 = vector.shape_cast %32 : vector<1x3x1xf32> to vector<3x1xf32>
    %34 = vector.shape_cast %33 : vector<3x1xf32> to vector<3x1xf32>
    %35 = vector.broadcast %34 : vector<3x1xf32> to vector<3x2xf32>
    %c11 = arith.constant 11 : index
    %c0_17 = arith.constant 0 : index
    %c0_18 = arith.constant 0 : index
    %36 = vector.load %arg1[%c11, %c0_17, %c0_18] : memref<12x3x1xf32, #tpu.memory_space<vmem>>, vector<1x3x1xf32>
    %37 = vector.shape_cast %36 : vector<1x3x1xf32> to vector<3x1xf32>
    %38 = vector.shape_cast %37 : vector<3x1xf32> to vector<3x1xf32>
    %39 = vector.broadcast %38 : vector<3x1xf32> to vector<3x2xf32>
    %cst = arith.constant 0.000000e+00 : f32
    %40 = vector.broadcast %cst : f32 to vector<1x2xf32>
    %c0_i32 = arith.constant 0 : i32
    %c7_i32 = arith.constant 7 : i32
    %41 = arith.minsi %c0_i32, %c7_i32 : i32
    %42 = arith.index_cast %41 : i32 to index
    %c0_19 = arith.constant 0 : index
    %c0_20 = arith.constant 0 : index
    %43 = vector.load %arg0[%42, %c0_19, %c0_20] : memref<8x3x2xf32, #tpu.memory_space<vmem>>, vector<1x3x2xf32>
    %44 = vector.shape_cast %43 : vector<1x3x2xf32> to vector<3x2xf32>
    %45 = vector.broadcast %40 : vector<1x2xf32> to vector<3x2xf32>
    %46 = arith.mulf %45, %3 : vector<3x2xf32>
    %47 = arith.addf %46, %7 : vector<3x2xf32>
    %48 = vector.extract_strided_slice %44 {offsets = [0, 0], sizes = [2, 2], strides = [1, 1]} : vector<3x2xf32> to vector<2x2xf32>
    %49 = vector.extract_strided_slice %47 {offsets = [0, 0], sizes = [2, 2], strides = [1, 1]} : vector<3x2xf32> to vector<2x2xf32>
    %50 = arith.addf %48, %49 : vector<2x2xf32>
    %51 = arith.negf %50 : vector<2x2xf32>
    %52 = math.exp %51 : vector<2x2xf32>
    %cst_21 = arith.constant 1.000000e+00 : f32
    %53 = vector.broadcast %cst_21 : f32 to vector<2x2xf32>
    %54 = arith.addf %53, %52 : vector<2x2xf32>
    %55 = arith.divf %53, %54 : vector<2x2xf32>
    %56 = vector.extract_strided_slice %55 {offsets = [0, 0], sizes = [1, 2], strides = [1, 1]} : vector<2x2xf32> to vector<1x2xf32>
    %57 = vector.extract_strided_slice %55 {offsets = [1, 0], sizes = [1, 2], strides = [1, 1]} : vector<2x2xf32> to vector<1x2xf32>
    %58 = vector.extract_strided_slice %44 {offsets = [2, 0], sizes = [1, 2], strides = [1, 1]} : vector<3x2xf32> to vector<1x2xf32>
    %59 = vector.extract_strided_slice %47 {offsets = [2, 0], sizes = [1, 2], strides = [1, 1]} : vector<3x2xf32> to vector<1x2xf32>
    %60 = arith.mulf %56, %59 : vector<1x2xf32>
    %61 = arith.addf %58, %60 : vector<1x2xf32>
    %62 = math.tanh %61 : vector<1x2xf32>
    %cst_22 = arith.constant 1.000000e+00 : f32
    %63 = vector.broadcast %cst_22 : f32 to vector<1x2xf32>
    %64 = arith.subf %63, %57 : vector<1x2xf32>
    %65 = arith.mulf %64, %62 : vector<1x2xf32>
    %66 = arith.mulf %57, %40 : vector<1x2xf32>
    %67 = arith.addf %65, %66 : vector<1x2xf32>
    %68 = vector.broadcast %40 : vector<1x2xf32> to vector<3x2xf32>
    %69 = arith.mulf %68, %11 : vector<3x2xf32>
    %70 = arith.addf %69, %19 : vector<3x2xf32>
    %71 = vector.broadcast %40 : vector<1x2xf32> to vector<3x2xf32>
    %72 = arith.mulf %71, %15 : vector<3x2xf32>
    %73 = arith.addf %72, %23 : vector<3x2xf32>
    %74 = vector.extract_strided_slice %70 {offsets = [0, 0], sizes = [2, 2], strides = [1, 1]} : vector<3x2xf32> to vector<2x2xf32>
    %75 = vector.extract_strided_slice %73 {offsets = [0, 0], sizes = [2, 2], strides = [1, 1]} : vector<3x2xf32> to vector<2x2xf32>
    %76 = arith.addf %74, %75 : vector<2x2xf32>
    %77 = arith.negf %76 : vector<2x2xf32>
    %78 = math.exp %77 : vector<2x2xf32>
    %cst_23 = arith.constant 1.000000e+00 : f32
    %79 = vector.broadcast %cst_23 : f32 to vector<2x2xf32>
    %80 = arith.addf %79, %78 : vector<2x2xf32>
    %81 = arith.divf %79, %80 : vector<2x2xf32>
    %82 = vector.extract_strided_slice %81 {offsets = [0, 0], sizes = [1, 2], strides = [1, 1]} : vector<2x2xf32> to vector<1x2xf32>
    %83 = vector.extract_strided_slice %81 {offsets = [1, 0], sizes = [1, 2], strides = [1, 1]} : vector<2x2xf32> to vector<1x2xf32>
    %84 = vector.extract_strided_slice %70 {offsets = [2, 0], sizes = [1, 2], strides = [1, 1]} : vector<3x2xf32> to vector<1x2xf32>
    %85 = vector.extract_strided_slice %73 {offsets = [2, 0], sizes = [1, 2], strides = [1, 1]} : vector<3x2xf32> to vector<1x2xf32>
    %86 = arith.mulf %82, %85 : vector<1x2xf32>
    %87 = arith.addf %84, %86 : vector<1x2xf32>
    %88 = math.tanh %87 : vector<1x2xf32>
    %cst_24 = arith.constant 1.000000e+00 : f32
    %89 = vector.broadcast %cst_24 : f32 to vector<1x2xf32>
    %90 = arith.subf %89, %83 : vector<1x2xf32>
    %91 = arith.mulf %90, %88 : vector<1x2xf32>
    %92 = arith.mulf %83, %40 : vector<1x2xf32>
    %93 = arith.addf %91, %92 : vector<1x2xf32>
    %94 = vector.broadcast %40 : vector<1x2xf32> to vector<3x2xf32>
    %95 = arith.mulf %94, %27 : vector<3x2xf32>
    %96 = arith.addf %95, %35 : vector<3x2xf32>
    %97 = vector.broadcast %40 : vector<1x2xf32> to vector<3x2xf32>
    %98 = arith.mulf %97, %31 : vector<3x2xf32>
    %99 = arith.addf %98, %39 : vector<3x2xf32>
    %100 = vector.extract_strided_slice %96 {offsets = [0, 0], sizes = [2, 2], strides = [1, 1]} : vector<3x2xf32> to vector<2x2xf32>
    %101 = vector.extract_strided_slice %99 {offsets = [0, 0], sizes = [2, 2], strides = [1, 1]} : vector<3x2xf32> to vector<2x2xf32>
    %102 = arith.addf %100, %101 : vector<2x2xf32>
    %103 = arith.negf %102 : vector<2x2xf32>
    %104 = math.exp %103 : vector<2x2xf32>
    %cst_25 = arith.constant 1.000000e+00 : f32
    %105 = vector.broadcast %cst_25 : f32 to vector<2x2xf32>
    %106 = arith.addf %105, %104 : vector<2x2xf32>
    %107 = arith.divf %105, %106 : vector<2x2xf32>
    %108 = vector.extract_strided_slice %107 {offsets = [0, 0], sizes = [1, 2], strides = [1, 1]} : vector<2x2xf32> to vector<1x2xf32>
    %109 = vector.extract_strided_slice %107 {offsets = [1, 0], sizes = [1, 2], strides = [1, 1]} : vector<2x2xf32> to vector<1x2xf32>
    %110 = vector.extract_strided_slice %96 {offsets = [2, 0], sizes = [1, 2], strides = [1, 1]} : vector<3x2xf32> to vector<1x2xf32>
    %111 = vector.extract_strided_slice %99 {offsets = [2, 0], sizes = [1, 2], strides = [1, 1]} : vector<3x2xf32> to vector<1x2xf32>
    %112 = arith.mulf %108, %111 : vector<1x2xf32>
    %113 = arith.addf %110, %112 : vector<1x2xf32>
    %114 = math.tanh %113 : vector<1x2xf32>
    %cst_26 = arith.constant 1.000000e+00 : f32
    %115 = vector.broadcast %cst_26 : f32 to vector<1x2xf32>
    %116 = arith.subf %115, %109 : vector<1x2xf32>
    %117 = arith.mulf %116, %114 : vector<1x2xf32>
    %118 = arith.mulf %109, %40 : vector<1x2xf32>
    %119 = arith.addf %117, %118 : vector<1x2xf32>
    %c8_i32 = arith.constant 8 : i32
    %120 = arith.cmpi slt, %c0_i32, %c8_i32 : i32
    %121 = arith.select %120, %67, %40 : vector<1x2xf32>
    %c1_i32 = arith.constant 1 : i32
    %122 = arith.cmpi sge, %c0_i32, %c1_i32 : i32
    %c8_i32_27 = arith.constant 8 : i32
    %123 = arith.cmpi sle, %c0_i32, %c8_i32_27 : i32
    %124 = arith.andi %122, %123 : i1
    %125 = arith.select %124, %93, %40 : vector<1x2xf32>
    %c2_i32 = arith.constant 2 : i32
    %126 = arith.cmpi sge, %c0_i32, %c2_i32 : i32
    %127 = arith.select %126, %119, %40 : vector<1x2xf32>
    %c1_i32_28 = arith.constant 1 : i32
    %c7_i32_29 = arith.constant 7 : i32
    %128 = arith.minsi %c1_i32_28, %c7_i32_29 : i32
    %129 = arith.index_cast %128 : i32 to index
    %c0_30 = arith.constant 0 : index
    %c0_31 = arith.constant 0 : index
    %130 = vector.load %arg0[%129, %c0_30, %c0_31] : memref<8x3x2xf32, #tpu.memory_space<vmem>>, vector<1x3x2xf32>
    %131 = vector.shape_cast %130 : vector<1x3x2xf32> to vector<3x2xf32>
    %132 = vector.broadcast %121 : vector<1x2xf32> to vector<3x2xf32>
    %133 = arith.mulf %132, %3 : vector<3x2xf32>
    %134 = arith.addf %133, %7 : vector<3x2xf32>
    %135 = vector.extract_strided_slice %131 {offsets = [0, 0], sizes = [2, 2], strides = [1, 1]} : vector<3x2xf32> to vector<2x2xf32>
    %136 = vector.extract_strided_slice %134 {offsets = [0, 0], sizes = [2, 2], strides = [1, 1]} : vector<3x2xf32> to vector<2x2xf32>
    %137 = arith.addf %135, %136 : vector<2x2xf32>
    %138 = arith.negf %137 : vector<2x2xf32>
    %139 = math.exp %138 : vector<2x2xf32>
    %cst_32 = arith.constant 1.000000e+00 : f32
    %140 = vector.broadcast %cst_32 : f32 to vector<2x2xf32>
    %141 = arith.addf %140, %139 : vector<2x2xf32>
    %142 = arith.divf %140, %141 : vector<2x2xf32>
    %143 = vector.extract_strided_slice %142 {offsets = [0, 0], sizes = [1, 2], strides = [1, 1]} : vector<2x2xf32> to vector<1x2xf32>
    %144 = vector.extract_strided_slice %142 {offsets = [1, 0], sizes = [1, 2], strides = [1, 1]} : vector<2x2xf32> to vector<1x2xf32>
    %145 = vector.extract_strided_slice %131 {offsets = [2, 0], sizes = [1, 2], strides = [1, 1]} : vector<3x2xf32> to vector<1x2xf32>
    %146 = vector.extract_strided_slice %134 {offsets = [2, 0], sizes = [1, 2], strides = [1, 1]} : vector<3x2xf32> to vector<1x2xf32>
    %147 = arith.mulf %143, %146 : vector<1x2xf32>
    %148 = arith.addf %145, %147 : vector<1x2xf32>
    %149 = math.tanh %148 : vector<1x2xf32>
    %cst_33 = arith.constant 1.000000e+00 : f32
    %150 = vector.broadcast %cst_33 : f32 to vector<1x2xf32>
    %151 = arith.subf %150, %144 : vector<1x2xf32>
    %152 = arith.mulf %151, %149 : vector<1x2xf32>
    %153 = arith.mulf %144, %121 : vector<1x2xf32>
    %154 = arith.addf %152, %153 : vector<1x2xf32>
    %155 = vector.broadcast %121 : vector<1x2xf32> to vector<3x2xf32>
    %156 = arith.mulf %155, %11 : vector<3x2xf32>
    %157 = arith.addf %156, %19 : vector<3x2xf32>
    %158 = vector.broadcast %125 : vector<1x2xf32> to vector<3x2xf32>
    %159 = arith.mulf %158, %15 : vector<3x2xf32>
    %160 = arith.addf %159, %23 : vector<3x2xf32>
    %161 = vector.extract_strided_slice %157 {offsets = [0, 0], sizes = [2, 2], strides = [1, 1]} : vector<3x2xf32> to vector<2x2xf32>
    %162 = vector.extract_strided_slice %160 {offsets = [0, 0], sizes = [2, 2], strides = [1, 1]} : vector<3x2xf32> to vector<2x2xf32>
    %163 = arith.addf %161, %162 : vector<2x2xf32>
    %164 = arith.negf %163 : vector<2x2xf32>
    %165 = math.exp %164 : vector<2x2xf32>
    %cst_34 = arith.constant 1.000000e+00 : f32
    %166 = vector.broadcast %cst_34 : f32 to vector<2x2xf32>
    %167 = arith.addf %166, %165 : vector<2x2xf32>
    %168 = arith.divf %166, %167 : vector<2x2xf32>
    %169 = vector.extract_strided_slice %168 {offsets = [0, 0], sizes = [1, 2], strides = [1, 1]} : vector<2x2xf32> to vector<1x2xf32>
    %170 = vector.extract_strided_slice %168 {offsets = [1, 0], sizes = [1, 2], strides = [1, 1]} : vector<2x2xf32> to vector<1x2xf32>
    %171 = vector.extract_strided_slice %157 {offsets = [2, 0], sizes = [1, 2], strides = [1, 1]} : vector<3x2xf32> to vector<1x2xf32>
    %172 = vector.extract_strided_slice %160 {offsets = [2, 0], sizes = [1, 2], strides = [1, 1]} : vector<3x2xf32> to vector<1x2xf32>
    %173 = arith.mulf %169, %172 : vector<1x2xf32>
    %174 = arith.addf %171, %173 : vector<1x2xf32>
    %175 = math.tanh %174 : vector<1x2xf32>
    %cst_35 = arith.constant 1.000000e+00 : f32
    %176 = vector.broadcast %cst_35 : f32 to vector<1x2xf32>
    %177 = arith.subf %176, %170 : vector<1x2xf32>
    %178 = arith.mulf %177, %175 : vector<1x2xf32>
    %179 = arith.mulf %170, %125 : vector<1x2xf32>
    %180 = arith.addf %178, %179 : vector<1x2xf32>
    %181 = vector.broadcast %125 : vector<1x2xf32> to vector<3x2xf32>
    %182 = arith.mulf %181, %27 : vector<3x2xf32>
    %183 = arith.addf %182, %35 : vector<3x2xf32>
    %184 = vector.broadcast %127 : vector<1x2xf32> to vector<3x2xf32>
    %185 = arith.mulf %184, %31 : vector<3x2xf32>
    %186 = arith.addf %185, %39 : vector<3x2xf32>
    %187 = vector.extract_strided_slice %183 {offsets = [0, 0], sizes = [2, 2], strides = [1, 1]} : vector<3x2xf32> to vector<2x2xf32>
    %188 = vector.extract_strided_slice %186 {offsets = [0, 0], sizes = [2, 2], strides = [1, 1]} : vector<3x2xf32> to vector<2x2xf32>
    %189 = arith.addf %187, %188 : vector<2x2xf32>
    %190 = arith.negf %189 : vector<2x2xf32>
    %191 = math.exp %190 : vector<2x2xf32>
    %cst_36 = arith.constant 1.000000e+00 : f32
    %192 = vector.broadcast %cst_36 : f32 to vector<2x2xf32>
    %193 = arith.addf %192, %191 : vector<2x2xf32>
    %194 = arith.divf %192, %193 : vector<2x2xf32>
    %195 = vector.extract_strided_slice %194 {offsets = [0, 0], sizes = [1, 2], strides = [1, 1]} : vector<2x2xf32> to vector<1x2xf32>
    %196 = vector.extract_strided_slice %194 {offsets = [1, 0], sizes = [1, 2], strides = [1, 1]} : vector<2x2xf32> to vector<1x2xf32>
    %197 = vector.extract_strided_slice %183 {offsets = [2, 0], sizes = [1, 2], strides = [1, 1]} : vector<3x2xf32> to vector<1x2xf32>
    %198 = vector.extract_strided_slice %186 {offsets = [2, 0], sizes = [1, 2], strides = [1, 1]} : vector<3x2xf32> to vector<1x2xf32>
    %199 = arith.mulf %195, %198 : vector<1x2xf32>
    %200 = arith.addf %197, %199 : vector<1x2xf32>
    %201 = math.tanh %200 : vector<1x2xf32>
    %cst_37 = arith.constant 1.000000e+00 : f32
    %202 = vector.broadcast %cst_37 : f32 to vector<1x2xf32>
    %203 = arith.subf %202, %196 : vector<1x2xf32>
    %204 = arith.mulf %203, %201 : vector<1x2xf32>
    %205 = arith.mulf %196, %127 : vector<1x2xf32>
    %206 = arith.addf %204, %205 : vector<1x2xf32>
    %c8_i32_38 = arith.constant 8 : i32
    %207 = arith.cmpi slt, %c1_i32_28, %c8_i32_38 : i32
    %208 = arith.select %207, %154, %121 : vector<1x2xf32>
    %c1_i32_39 = arith.constant 1 : i32
    %209 = arith.cmpi sge, %c1_i32_28, %c1_i32_39 : i32
    %c8_i32_40 = arith.constant 8 : i32
    %210 = arith.cmpi sle, %c1_i32_28, %c8_i32_40 : i32
    %211 = arith.andi %209, %210 : i1
    %212 = arith.select %211, %180, %125 : vector<1x2xf32>
    %c2_i32_41 = arith.constant 2 : i32
    %213 = arith.cmpi sge, %c1_i32_28, %c2_i32_41 : i32
    %214 = arith.select %213, %206, %127 : vector<1x2xf32>
    %c2_i32_42 = arith.constant 2 : i32
    %c7_i32_43 = arith.constant 7 : i32
    %215 = arith.minsi %c2_i32_42, %c7_i32_43 : i32
    %216 = arith.index_cast %215 : i32 to index
    %c0_44 = arith.constant 0 : index
    %c0_45 = arith.constant 0 : index
    %217 = vector.load %arg0[%216, %c0_44, %c0_45] : memref<8x3x2xf32, #tpu.memory_space<vmem>>, vector<1x3x2xf32>
    %218 = vector.shape_cast %217 : vector<1x3x2xf32> to vector<3x2xf32>
    %219 = vector.broadcast %208 : vector<1x2xf32> to vector<3x2xf32>
    %220 = arith.mulf %219, %3 : vector<3x2xf32>
    %221 = arith.addf %220, %7 : vector<3x2xf32>
    %222 = vector.extract_strided_slice %218 {offsets = [0, 0], sizes = [2, 2], strides = [1, 1]} : vector<3x2xf32> to vector<2x2xf32>
    %223 = vector.extract_strided_slice %221 {offsets = [0, 0], sizes = [2, 2], strides = [1, 1]} : vector<3x2xf32> to vector<2x2xf32>
    %224 = arith.addf %222, %223 : vector<2x2xf32>
    %225 = arith.negf %224 : vector<2x2xf32>
    %226 = math.exp %225 : vector<2x2xf32>
    %cst_46 = arith.constant 1.000000e+00 : f32
    %227 = vector.broadcast %cst_46 : f32 to vector<2x2xf32>
    %228 = arith.addf %227, %226 : vector<2x2xf32>
    %229 = arith.divf %227, %228 : vector<2x2xf32>
    %230 = vector.extract_strided_slice %229 {offsets = [0, 0], sizes = [1, 2], strides = [1, 1]} : vector<2x2xf32> to vector<1x2xf32>
    %231 = vector.extract_strided_slice %229 {offsets = [1, 0], sizes = [1, 2], strides = [1, 1]} : vector<2x2xf32> to vector<1x2xf32>
    %232 = vector.extract_strided_slice %218 {offsets = [2, 0], sizes = [1, 2], strides = [1, 1]} : vector<3x2xf32> to vector<1x2xf32>
    %233 = vector.extract_strided_slice %221 {offsets = [2, 0], sizes = [1, 2], strides = [1, 1]} : vector<3x2xf32> to vector<1x2xf32>
    %234 = arith.mulf %230, %233 : vector<1x2xf32>
    %235 = arith.addf %232, %234 : vector<1x2xf32>
    %236 = math.tanh %235 : vector<1x2xf32>
    %cst_47 = arith.constant 1.000000e+00 : f32
    %237 = vector.broadcast %cst_47 : f32 to vector<1x2xf32>
    %238 = arith.subf %237, %231 : vector<1x2xf32>
    %239 = arith.mulf %238, %236 : vector<1x2xf32>
    %240 = arith.mulf %231, %208 : vector<1x2xf32>
    %241 = arith.addf %239, %240 : vector<1x2xf32>
    %242 = vector.broadcast %208 : vector<1x2xf32> to vector<3x2xf32>
    %243 = arith.mulf %242, %11 : vector<3x2xf32>
    %244 = arith.addf %243, %19 : vector<3x2xf32>
    %245 = vector.broadcast %212 : vector<1x2xf32> to vector<3x2xf32>
    %246 = arith.mulf %245, %15 : vector<3x2xf32>
    %247 = arith.addf %246, %23 : vector<3x2xf32>
    %248 = vector.extract_strided_slice %244 {offsets = [0, 0], sizes = [2, 2], strides = [1, 1]} : vector<3x2xf32> to vector<2x2xf32>
    %249 = vector.extract_strided_slice %247 {offsets = [0, 0], sizes = [2, 2], strides = [1, 1]} : vector<3x2xf32> to vector<2x2xf32>
    %250 = arith.addf %248, %249 : vector<2x2xf32>
    %251 = arith.negf %250 : vector<2x2xf32>
    %252 = math.exp %251 : vector<2x2xf32>
    %cst_48 = arith.constant 1.000000e+00 : f32
    %253 = vector.broadcast %cst_48 : f32 to vector<2x2xf32>
    %254 = arith.addf %253, %252 : vector<2x2xf32>
    %255 = arith.divf %253, %254 : vector<2x2xf32>
    %256 = vector.extract_strided_slice %255 {offsets = [0, 0], sizes = [1, 2], strides = [1, 1]} : vector<2x2xf32> to vector<1x2xf32>
    %257 = vector.extract_strided_slice %255 {offsets = [1, 0], sizes = [1, 2], strides = [1, 1]} : vector<2x2xf32> to vector<1x2xf32>
    %258 = vector.extract_strided_slice %244 {offsets = [2, 0], sizes = [1, 2], strides = [1, 1]} : vector<3x2xf32> to vector<1x2xf32>
    %259 = vector.extract_strided_slice %247 {offsets = [2, 0], sizes = [1, 2], strides = [1, 1]} : vector<3x2xf32> to vector<1x2xf32>
    %260 = arith.mulf %256, %259 : vector<1x2xf32>
    %261 = arith.addf %258, %260 : vector<1x2xf32>
    %262 = math.tanh %261 : vector<1x2xf32>
    %cst_49 = arith.constant 1.000000e+00 : f32
    %263 = vector.broadcast %cst_49 : f32 to vector<1x2xf32>
    %264 = arith.subf %263, %257 : vector<1x2xf32>
    %265 = arith.mulf %264, %262 : vector<1x2xf32>
    %266 = arith.mulf %257, %212 : vector<1x2xf32>
    %267 = arith.addf %265, %266 : vector<1x2xf32>
    %268 = vector.broadcast %212 : vector<1x2xf32> to vector<3x2xf32>
    %269 = arith.mulf %268, %27 : vector<3x2xf32>
    %270 = arith.addf %269, %35 : vector<3x2xf32>
    %271 = vector.broadcast %214 : vector<1x2xf32> to vector<3x2xf32>
    %272 = arith.mulf %271, %31 : vector<3x2xf32>
    %273 = arith.addf %272, %39 : vector<3x2xf32>
    %274 = vector.extract_strided_slice %270 {offsets = [0, 0], sizes = [2, 2], strides = [1, 1]} : vector<3x2xf32> to vector<2x2xf32>
    %275 = vector.extract_strided_slice %273 {offsets = [0, 0], sizes = [2, 2], strides = [1, 1]} : vector<3x2xf32> to vector<2x2xf32>
    %276 = arith.addf %274, %275 : vector<2x2xf32>
    %277 = arith.negf %276 : vector<2x2xf32>
    %278 = math.exp %277 : vector<2x2xf32>
    %cst_50 = arith.constant 1.000000e+00 : f32
    %279 = vector.broadcast %cst_50 : f32 to vector<2x2xf32>
    %280 = arith.addf %279, %278 : vector<2x2xf32>
    %281 = arith.divf %279, %280 : vector<2x2xf32>
    %282 = vector.extract_strided_slice %281 {offsets = [0, 0], sizes = [1, 2], strides = [1, 1]} : vector<2x2xf32> to vector<1x2xf32>
    %283 = vector.extract_strided_slice %281 {offsets = [1, 0], sizes = [1, 2], strides = [1, 1]} : vector<2x2xf32> to vector<1x2xf32>
    %284 = vector.extract_strided_slice %270 {offsets = [2, 0], sizes = [1, 2], strides = [1, 1]} : vector<3x2xf32> to vector<1x2xf32>
    %285 = vector.extract_strided_slice %273 {offsets = [2, 0], sizes = [1, 2], strides = [1, 1]} : vector<3x2xf32> to vector<1x2xf32>
    %286 = arith.mulf %282, %285 : vector<1x2xf32>
    %287 = arith.addf %284, %286 : vector<1x2xf32>
    %288 = math.tanh %287 : vector<1x2xf32>
    %cst_51 = arith.constant 1.000000e+00 : f32
    %289 = vector.broadcast %cst_51 : f32 to vector<1x2xf32>
    %290 = arith.subf %289, %283 : vector<1x2xf32>
    %291 = arith.mulf %290, %288 : vector<1x2xf32>
    %292 = arith.mulf %283, %214 : vector<1x2xf32>
    %293 = arith.addf %291, %292 : vector<1x2xf32>
    %c8_i32_52 = arith.constant 8 : i32
    %294 = arith.cmpi slt, %c2_i32_42, %c8_i32_52 : i32
    %295 = arith.select %294, %241, %208 : vector<1x2xf32>
    %c1_i32_53 = arith.constant 1 : i32
    %296 = arith.cmpi sge, %c2_i32_42, %c1_i32_53 : i32
    %c8_i32_54 = arith.constant 8 : i32
    %297 = arith.cmpi sle, %c2_i32_42, %c8_i32_54 : i32
    %298 = arith.andi %296, %297 : i1
    %299 = arith.select %298, %267, %212 : vector<1x2xf32>
    %c2_i32_55 = arith.constant 2 : i32
    %300 = arith.cmpi sge, %c2_i32_42, %c2_i32_55 : i32
    %301 = arith.select %300, %293, %214 : vector<1x2xf32>
    %c3_i32 = arith.constant 3 : i32
    %c7_i32_56 = arith.constant 7 : i32
    %302 = arith.minsi %c3_i32, %c7_i32_56 : i32
    %303 = arith.index_cast %302 : i32 to index
    %c0_57 = arith.constant 0 : index
    %c0_58 = arith.constant 0 : index
    %304 = vector.load %arg0[%303, %c0_57, %c0_58] : memref<8x3x2xf32, #tpu.memory_space<vmem>>, vector<1x3x2xf32>
    %305 = vector.shape_cast %304 : vector<1x3x2xf32> to vector<3x2xf32>
    %306 = vector.broadcast %295 : vector<1x2xf32> to vector<3x2xf32>
    %307 = arith.mulf %306, %3 : vector<3x2xf32>
    %308 = arith.addf %307, %7 : vector<3x2xf32>
    %309 = vector.extract_strided_slice %305 {offsets = [0, 0], sizes = [2, 2], strides = [1, 1]} : vector<3x2xf32> to vector<2x2xf32>
    %310 = vector.extract_strided_slice %308 {offsets = [0, 0], sizes = [2, 2], strides = [1, 1]} : vector<3x2xf32> to vector<2x2xf32>
    %311 = arith.addf %309, %310 : vector<2x2xf32>
    %312 = arith.negf %311 : vector<2x2xf32>
    %313 = math.exp %312 : vector<2x2xf32>
    %cst_59 = arith.constant 1.000000e+00 : f32
    %314 = vector.broadcast %cst_59 : f32 to vector<2x2xf32>
    %315 = arith.addf %314, %313 : vector<2x2xf32>
    %316 = arith.divf %314, %315 : vector<2x2xf32>
    %317 = vector.extract_strided_slice %316 {offsets = [0, 0], sizes = [1, 2], strides = [1, 1]} : vector<2x2xf32> to vector<1x2xf32>
    %318 = vector.extract_strided_slice %316 {offsets = [1, 0], sizes = [1, 2], strides = [1, 1]} : vector<2x2xf32> to vector<1x2xf32>
    %319 = vector.extract_strided_slice %305 {offsets = [2, 0], sizes = [1, 2], strides = [1, 1]} : vector<3x2xf32> to vector<1x2xf32>
    %320 = vector.extract_strided_slice %308 {offsets = [2, 0], sizes = [1, 2], strides = [1, 1]} : vector<3x2xf32> to vector<1x2xf32>
    %321 = arith.mulf %317, %320 : vector<1x2xf32>
    %322 = arith.addf %319, %321 : vector<1x2xf32>
    %323 = math.tanh %322 : vector<1x2xf32>
    %cst_60 = arith.constant 1.000000e+00 : f32
    %324 = vector.broadcast %cst_60 : f32 to vector<1x2xf32>
    %325 = arith.subf %324, %318 : vector<1x2xf32>
    %326 = arith.mulf %325, %323 : vector<1x2xf32>
    %327 = arith.mulf %318, %295 : vector<1x2xf32>
    %328 = arith.addf %326, %327 : vector<1x2xf32>
    %329 = vector.broadcast %295 : vector<1x2xf32> to vector<3x2xf32>
    %330 = arith.mulf %329, %11 : vector<3x2xf32>
    %331 = arith.addf %330, %19 : vector<3x2xf32>
    %332 = vector.broadcast %299 : vector<1x2xf32> to vector<3x2xf32>
    %333 = arith.mulf %332, %15 : vector<3x2xf32>
    %334 = arith.addf %333, %23 : vector<3x2xf32>
    %335 = vector.extract_strided_slice %331 {offsets = [0, 0], sizes = [2, 2], strides = [1, 1]} : vector<3x2xf32> to vector<2x2xf32>
    %336 = vector.extract_strided_slice %334 {offsets = [0, 0], sizes = [2, 2], strides = [1, 1]} : vector<3x2xf32> to vector<2x2xf32>
    %337 = arith.addf %335, %336 : vector<2x2xf32>
    %338 = arith.negf %337 : vector<2x2xf32>
    %339 = math.exp %338 : vector<2x2xf32>
    %cst_61 = arith.constant 1.000000e+00 : f32
    %340 = vector.broadcast %cst_61 : f32 to vector<2x2xf32>
    %341 = arith.addf %340, %339 : vector<2x2xf32>
    %342 = arith.divf %340, %341 : vector<2x2xf32>
    %343 = vector.extract_strided_slice %342 {offsets = [0, 0], sizes = [1, 2], strides = [1, 1]} : vector<2x2xf32> to vector<1x2xf32>
    %344 = vector.extract_strided_slice %342 {offsets = [1, 0], sizes = [1, 2], strides = [1, 1]} : vector<2x2xf32> to vector<1x2xf32>
    %345 = vector.extract_strided_slice %331 {offsets = [2, 0], sizes = [1, 2], strides = [1, 1]} : vector<3x2xf32> to vector<1x2xf32>
    %346 = vector.extract_strided_slice %334 {offsets = [2, 0], sizes = [1, 2], strides = [1, 1]} : vector<3x2xf32> to vector<1x2xf32>
    %347 = arith.mulf %343, %346 : vector<1x2xf32>
    %348 = arith.addf %345, %347 : vector<1x2xf32>
    %349 = math.tanh %348 : vector<1x2xf32>
    %cst_62 = arith.constant 1.000000e+00 : f32
    %350 = vector.broadcast %cst_62 : f32 to vector<1x2xf32>
    %351 = arith.subf %350, %344 : vector<1x2xf32>
    %352 = arith.mulf %351, %349 : vector<1x2xf32>
    %353 = arith.mulf %344, %299 : vector<1x2xf32>
    %354 = arith.addf %352, %353 : vector<1x2xf32>
    %355 = vector.broadcast %299 : vector<1x2xf32> to vector<3x2xf32>
    %356 = arith.mulf %355, %27 : vector<3x2xf32>
    %357 = arith.addf %356, %35 : vector<3x2xf32>
    %358 = vector.broadcast %301 : vector<1x2xf32> to vector<3x2xf32>
    %359 = arith.mulf %358, %31 : vector<3x2xf32>
    %360 = arith.addf %359, %39 : vector<3x2xf32>
    %361 = vector.extract_strided_slice %357 {offsets = [0, 0], sizes = [2, 2], strides = [1, 1]} : vector<3x2xf32> to vector<2x2xf32>
    %362 = vector.extract_strided_slice %360 {offsets = [0, 0], sizes = [2, 2], strides = [1, 1]} : vector<3x2xf32> to vector<2x2xf32>
    %363 = arith.addf %361, %362 : vector<2x2xf32>
    %364 = arith.negf %363 : vector<2x2xf32>
    %365 = math.exp %364 : vector<2x2xf32>
    %cst_63 = arith.constant 1.000000e+00 : f32
    %366 = vector.broadcast %cst_63 : f32 to vector<2x2xf32>
    %367 = arith.addf %366, %365 : vector<2x2xf32>
    %368 = arith.divf %366, %367 : vector<2x2xf32>
    %369 = vector.extract_strided_slice %368 {offsets = [0, 0], sizes = [1, 2], strides = [1, 1]} : vector<2x2xf32> to vector<1x2xf32>
    %370 = vector.extract_strided_slice %368 {offsets = [1, 0], sizes = [1, 2], strides = [1, 1]} : vector<2x2xf32> to vector<1x2xf32>
    %371 = vector.extract_strided_slice %357 {offsets = [2, 0], sizes = [1, 2], strides = [1, 1]} : vector<3x2xf32> to vector<1x2xf32>
    %372 = vector.extract_strided_slice %360 {offsets = [2, 0], sizes = [1, 2], strides = [1, 1]} : vector<3x2xf32> to vector<1x2xf32>
    %373 = arith.mulf %369, %372 : vector<1x2xf32>
    %374 = arith.addf %371, %373 : vector<1x2xf32>
    %375 = math.tanh %374 : vector<1x2xf32>
    %cst_64 = arith.constant 1.000000e+00 : f32
    %376 = vector.broadcast %cst_64 : f32 to vector<1x2xf32>
    %377 = arith.subf %376, %370 : vector<1x2xf32>
    %378 = arith.mulf %377, %375 : vector<1x2xf32>
    %379 = arith.mulf %370, %301 : vector<1x2xf32>
    %380 = arith.addf %378, %379 : vector<1x2xf32>
    %c8_i32_65 = arith.constant 8 : i32
    %381 = arith.cmpi slt, %c3_i32, %c8_i32_65 : i32
    %382 = arith.select %381, %328, %295 : vector<1x2xf32>
    %c1_i32_66 = arith.constant 1 : i32
    %383 = arith.cmpi sge, %c3_i32, %c1_i32_66 : i32
    %c8_i32_67 = arith.constant 8 : i32
    %384 = arith.cmpi sle, %c3_i32, %c8_i32_67 : i32
    %385 = arith.andi %383, %384 : i1
    %386 = arith.select %385, %354, %299 : vector<1x2xf32>
    %c2_i32_68 = arith.constant 2 : i32
    %387 = arith.cmpi sge, %c3_i32, %c2_i32_68 : i32
    %388 = arith.select %387, %380, %301 : vector<1x2xf32>
    %c4_i32 = arith.constant 4 : i32
    %c7_i32_69 = arith.constant 7 : i32
    %389 = arith.minsi %c4_i32, %c7_i32_69 : i32
    %390 = arith.index_cast %389 : i32 to index
    %c0_70 = arith.constant 0 : index
    %c0_71 = arith.constant 0 : index
    %391 = vector.load %arg0[%390, %c0_70, %c0_71] : memref<8x3x2xf32, #tpu.memory_space<vmem>>, vector<1x3x2xf32>
    %392 = vector.shape_cast %391 : vector<1x3x2xf32> to vector<3x2xf32>
    %393 = vector.broadcast %382 : vector<1x2xf32> to vector<3x2xf32>
    %394 = arith.mulf %393, %3 : vector<3x2xf32>
    %395 = arith.addf %394, %7 : vector<3x2xf32>
    %396 = vector.extract_strided_slice %392 {offsets = [0, 0], sizes = [2, 2], strides = [1, 1]} : vector<3x2xf32> to vector<2x2xf32>
    %397 = vector.extract_strided_slice %395 {offsets = [0, 0], sizes = [2, 2], strides = [1, 1]} : vector<3x2xf32> to vector<2x2xf32>
    %398 = arith.addf %396, %397 : vector<2x2xf32>
    %399 = arith.negf %398 : vector<2x2xf32>
    %400 = math.exp %399 : vector<2x2xf32>
    %cst_72 = arith.constant 1.000000e+00 : f32
    %401 = vector.broadcast %cst_72 : f32 to vector<2x2xf32>
    %402 = arith.addf %401, %400 : vector<2x2xf32>
    %403 = arith.divf %401, %402 : vector<2x2xf32>
    %404 = vector.extract_strided_slice %403 {offsets = [0, 0], sizes = [1, 2], strides = [1, 1]} : vector<2x2xf32> to vector<1x2xf32>
    %405 = vector.extract_strided_slice %403 {offsets = [1, 0], sizes = [1, 2], strides = [1, 1]} : vector<2x2xf32> to vector<1x2xf32>
    %406 = vector.extract_strided_slice %392 {offsets = [2, 0], sizes = [1, 2], strides = [1, 1]} : vector<3x2xf32> to vector<1x2xf32>
    %407 = vector.extract_strided_slice %395 {offsets = [2, 0], sizes = [1, 2], strides = [1, 1]} : vector<3x2xf32> to vector<1x2xf32>
    %408 = arith.mulf %404, %407 : vector<1x2xf32>
    %409 = arith.addf %406, %408 : vector<1x2xf32>
    %410 = math.tanh %409 : vector<1x2xf32>
    %cst_73 = arith.constant 1.000000e+00 : f32
    %411 = vector.broadcast %cst_73 : f32 to vector<1x2xf32>
    %412 = arith.subf %411, %405 : vector<1x2xf32>
    %413 = arith.mulf %412, %410 : vector<1x2xf32>
    %414 = arith.mulf %405, %382 : vector<1x2xf32>
    %415 = arith.addf %413, %414 : vector<1x2xf32>
    %416 = vector.broadcast %382 : vector<1x2xf32> to vector<3x2xf32>
    %417 = arith.mulf %416, %11 : vector<3x2xf32>
    %418 = arith.addf %417, %19 : vector<3x2xf32>
    %419 = vector.broadcast %386 : vector<1x2xf32> to vector<3x2xf32>
    %420 = arith.mulf %419, %15 : vector<3x2xf32>
    %421 = arith.addf %420, %23 : vector<3x2xf32>
    %422 = vector.extract_strided_slice %418 {offsets = [0, 0], sizes = [2, 2], strides = [1, 1]} : vector<3x2xf32> to vector<2x2xf32>
    %423 = vector.extract_strided_slice %421 {offsets = [0, 0], sizes = [2, 2], strides = [1, 1]} : vector<3x2xf32> to vector<2x2xf32>
    %424 = arith.addf %422, %423 : vector<2x2xf32>
    %425 = arith.negf %424 : vector<2x2xf32>
    %426 = math.exp %425 : vector<2x2xf32>
    %cst_74 = arith.constant 1.000000e+00 : f32
    %427 = vector.broadcast %cst_74 : f32 to vector<2x2xf32>
    %428 = arith.addf %427, %426 : vector<2x2xf32>
    %429 = arith.divf %427, %428 : vector<2x2xf32>
    %430 = vector.extract_strided_slice %429 {offsets = [0, 0], sizes = [1, 2], strides = [1, 1]} : vector<2x2xf32> to vector<1x2xf32>
    %431 = vector.extract_strided_slice %429 {offsets = [1, 0], sizes = [1, 2], strides = [1, 1]} : vector<2x2xf32> to vector<1x2xf32>
    %432 = vector.extract_strided_slice %418 {offsets = [2, 0], sizes = [1, 2], strides = [1, 1]} : vector<3x2xf32> to vector<1x2xf32>
    %433 = vector.extract_strided_slice %421 {offsets = [2, 0], sizes = [1, 2], strides = [1, 1]} : vector<3x2xf32> to vector<1x2xf32>
    %434 = arith.mulf %430, %433 : vector<1x2xf32>
    %435 = arith.addf %432, %434 : vector<1x2xf32>
    %436 = math.tanh %435 : vector<1x2xf32>
    %cst_75 = arith.constant 1.000000e+00 : f32
    %437 = vector.broadcast %cst_75 : f32 to vector<1x2xf32>
    %438 = arith.subf %437, %431 : vector<1x2xf32>
    %439 = arith.mulf %438, %436 : vector<1x2xf32>
    %440 = arith.mulf %431, %386 : vector<1x2xf32>
    %441 = arith.addf %439, %440 : vector<1x2xf32>
    %442 = vector.broadcast %386 : vector<1x2xf32> to vector<3x2xf32>
    %443 = arith.mulf %442, %27 : vector<3x2xf32>
    %444 = arith.addf %443, %35 : vector<3x2xf32>
    %445 = vector.broadcast %388 : vector<1x2xf32> to vector<3x2xf32>
    %446 = arith.mulf %445, %31 : vector<3x2xf32>
    %447 = arith.addf %446, %39 : vector<3x2xf32>
    %448 = vector.extract_strided_slice %444 {offsets = [0, 0], sizes = [2, 2], strides = [1, 1]} : vector<3x2xf32> to vector<2x2xf32>
    %449 = vector.extract_strided_slice %447 {offsets = [0, 0], sizes = [2, 2], strides = [1, 1]} : vector<3x2xf32> to vector<2x2xf32>
    %450 = arith.addf %448, %449 : vector<2x2xf32>
    %451 = arith.negf %450 : vector<2x2xf32>
    %452 = math.exp %451 : vector<2x2xf32>
    %cst_76 = arith.constant 1.000000e+00 : f32
    %453 = vector.broadcast %cst_76 : f32 to vector<2x2xf32>
    %454 = arith.addf %453, %452 : vector<2x2xf32>
    %455 = arith.divf %453, %454 : vector<2x2xf32>
    %456 = vector.extract_strided_slice %455 {offsets = [0, 0], sizes = [1, 2], strides = [1, 1]} : vector<2x2xf32> to vector<1x2xf32>
    %457 = vector.extract_strided_slice %455 {offsets = [1, 0], sizes = [1, 2], strides = [1, 1]} : vector<2x2xf32> to vector<1x2xf32>
    %458 = vector.extract_strided_slice %444 {offsets = [2, 0], sizes = [1, 2], strides = [1, 1]} : vector<3x2xf32> to vector<1x2xf32>
    %459 = vector.extract_strided_slice %447 {offsets = [2, 0], sizes = [1, 2], strides = [1, 1]} : vector<3x2xf32> to vector<1x2xf32>
    %460 = arith.mulf %456, %459 : vector<1x2xf32>
    %461 = arith.addf %458, %460 : vector<1x2xf32>
    %462 = math.tanh %461 : vector<1x2xf32>
    %cst_77 = arith.constant 1.000000e+00 : f32
    %463 = vector.broadcast %cst_77 : f32 to vector<1x2xf32>
    %464 = arith.subf %463, %457 : vector<1x2xf32>
    %465 = arith.mulf %464, %462 : vector<1x2xf32>
    %466 = arith.mulf %457, %388 : vector<1x2xf32>
    %467 = arith.addf %465, %466 : vector<1x2xf32>
    %c8_i32_78 = arith.constant 8 : i32
    %468 = arith.cmpi slt, %c4_i32, %c8_i32_78 : i32
    %469 = arith.select %468, %415, %382 : vector<1x2xf32>
    %c1_i32_79 = arith.constant 1 : i32
    %470 = arith.cmpi sge, %c4_i32, %c1_i32_79 : i32
    %c8_i32_80 = arith.constant 8 : i32
    %471 = arith.cmpi sle, %c4_i32, %c8_i32_80 : i32
    %472 = arith.andi %470, %471 : i1
    %473 = arith.select %472, %441, %386 : vector<1x2xf32>
    %c2_i32_81 = arith.constant 2 : i32
    %474 = arith.cmpi sge, %c4_i32, %c2_i32_81 : i32
    %475 = arith.select %474, %467, %388 : vector<1x2xf32>
    %c5_i32 = arith.constant 5 : i32
    %c7_i32_82 = arith.constant 7 : i32
    %476 = arith.minsi %c5_i32, %c7_i32_82 : i32
    %477 = arith.index_cast %476 : i32 to index
    %c0_83 = arith.constant 0 : index
    %c0_84 = arith.constant 0 : index
    %478 = vector.load %arg0[%477, %c0_83, %c0_84] : memref<8x3x2xf32, #tpu.memory_space<vmem>>, vector<1x3x2xf32>
    %479 = vector.shape_cast %478 : vector<1x3x2xf32> to vector<3x2xf32>
    %480 = vector.broadcast %469 : vector<1x2xf32> to vector<3x2xf32>
    %481 = arith.mulf %480, %3 : vector<3x2xf32>
    %482 = arith.addf %481, %7 : vector<3x2xf32>
    %483 = vector.extract_strided_slice %479 {offsets = [0, 0], sizes = [2, 2], strides = [1, 1]} : vector<3x2xf32> to vector<2x2xf32>
    %484 = vector.extract_strided_slice %482 {offsets = [0, 0], sizes = [2, 2], strides = [1, 1]} : vector<3x2xf32> to vector<2x2xf32>
    %485 = arith.addf %483, %484 : vector<2x2xf32>
    %486 = arith.negf %485 : vector<2x2xf32>
    %487 = math.exp %486 : vector<2x2xf32>
    %cst_85 = arith.constant 1.000000e+00 : f32
    %488 = vector.broadcast %cst_85 : f32 to vector<2x2xf32>
    %489 = arith.addf %488, %487 : vector<2x2xf32>
    %490 = arith.divf %488, %489 : vector<2x2xf32>
    %491 = vector.extract_strided_slice %490 {offsets = [0, 0], sizes = [1, 2], strides = [1, 1]} : vector<2x2xf32> to vector<1x2xf32>
    %492 = vector.extract_strided_slice %490 {offsets = [1, 0], sizes = [1, 2], strides = [1, 1]} : vector<2x2xf32> to vector<1x2xf32>
    %493 = vector.extract_strided_slice %479 {offsets = [2, 0], sizes = [1, 2], strides = [1, 1]} : vector<3x2xf32> to vector<1x2xf32>
    %494 = vector.extract_strided_slice %482 {offsets = [2, 0], sizes = [1, 2], strides = [1, 1]} : vector<3x2xf32> to vector<1x2xf32>
    %495 = arith.mulf %491, %494 : vector<1x2xf32>
    %496 = arith.addf %493, %495 : vector<1x2xf32>
    %497 = math.tanh %496 : vector<1x2xf32>
    %cst_86 = arith.constant 1.000000e+00 : f32
    %498 = vector.broadcast %cst_86 : f32 to vector<1x2xf32>
    %499 = arith.subf %498, %492 : vector<1x2xf32>
    %500 = arith.mulf %499, %497 : vector<1x2xf32>
    %501 = arith.mulf %492, %469 : vector<1x2xf32>
    %502 = arith.addf %500, %501 : vector<1x2xf32>
    %503 = vector.broadcast %469 : vector<1x2xf32> to vector<3x2xf32>
    %504 = arith.mulf %503, %11 : vector<3x2xf32>
    %505 = arith.addf %504, %19 : vector<3x2xf32>
    %506 = vector.broadcast %473 : vector<1x2xf32> to vector<3x2xf32>
    %507 = arith.mulf %506, %15 : vector<3x2xf32>
    %508 = arith.addf %507, %23 : vector<3x2xf32>
    %509 = vector.extract_strided_slice %505 {offsets = [0, 0], sizes = [2, 2], strides = [1, 1]} : vector<3x2xf32> to vector<2x2xf32>
    %510 = vector.extract_strided_slice %508 {offsets = [0, 0], sizes = [2, 2], strides = [1, 1]} : vector<3x2xf32> to vector<2x2xf32>
    %511 = arith.addf %509, %510 : vector<2x2xf32>
    %512 = arith.negf %511 : vector<2x2xf32>
    %513 = math.exp %512 : vector<2x2xf32>
    %cst_87 = arith.constant 1.000000e+00 : f32
    %514 = vector.broadcast %cst_87 : f32 to vector<2x2xf32>
    %515 = arith.addf %514, %513 : vector<2x2xf32>
    %516 = arith.divf %514, %515 : vector<2x2xf32>
    %517 = vector.extract_strided_slice %516 {offsets = [0, 0], sizes = [1, 2], strides = [1, 1]} : vector<2x2xf32> to vector<1x2xf32>
    %518 = vector.extract_strided_slice %516 {offsets = [1, 0], sizes = [1, 2], strides = [1, 1]} : vector<2x2xf32> to vector<1x2xf32>
    %519 = vector.extract_strided_slice %505 {offsets = [2, 0], sizes = [1, 2], strides = [1, 1]} : vector<3x2xf32> to vector<1x2xf32>
    %520 = vector.extract_strided_slice %508 {offsets = [2, 0], sizes = [1, 2], strides = [1, 1]} : vector<3x2xf32> to vector<1x2xf32>
    %521 = arith.mulf %517, %520 : vector<1x2xf32>
    %522 = arith.addf %519, %521 : vector<1x2xf32>
    %523 = math.tanh %522 : vector<1x2xf32>
    %cst_88 = arith.constant 1.000000e+00 : f32
    %524 = vector.broadcast %cst_88 : f32 to vector<1x2xf32>
    %525 = arith.subf %524, %518 : vector<1x2xf32>
    %526 = arith.mulf %525, %523 : vector<1x2xf32>
    %527 = arith.mulf %518, %473 : vector<1x2xf32>
    %528 = arith.addf %526, %527 : vector<1x2xf32>
    %529 = vector.broadcast %473 : vector<1x2xf32> to vector<3x2xf32>
    %530 = arith.mulf %529, %27 : vector<3x2xf32>
    %531 = arith.addf %530, %35 : vector<3x2xf32>
    %532 = vector.broadcast %475 : vector<1x2xf32> to vector<3x2xf32>
    %533 = arith.mulf %532, %31 : vector<3x2xf32>
    %534 = arith.addf %533, %39 : vector<3x2xf32>
    %535 = vector.extract_strided_slice %531 {offsets = [0, 0], sizes = [2, 2], strides = [1, 1]} : vector<3x2xf32> to vector<2x2xf32>
    %536 = vector.extract_strided_slice %534 {offsets = [0, 0], sizes = [2, 2], strides = [1, 1]} : vector<3x2xf32> to vector<2x2xf32>
    %537 = arith.addf %535, %536 : vector<2x2xf32>
    %538 = arith.negf %537 : vector<2x2xf32>
    %539 = math.exp %538 : vector<2x2xf32>
    %cst_89 = arith.constant 1.000000e+00 : f32
    %540 = vector.broadcast %cst_89 : f32 to vector<2x2xf32>
    %541 = arith.addf %540, %539 : vector<2x2xf32>
    %542 = arith.divf %540, %541 : vector<2x2xf32>
    %543 = vector.extract_strided_slice %542 {offsets = [0, 0], sizes = [1, 2], strides = [1, 1]} : vector<2x2xf32> to vector<1x2xf32>
    %544 = vector.extract_strided_slice %542 {offsets = [1, 0], sizes = [1, 2], strides = [1, 1]} : vector<2x2xf32> to vector<1x2xf32>
    %545 = vector.extract_strided_slice %531 {offsets = [2, 0], sizes = [1, 2], strides = [1, 1]} : vector<3x2xf32> to vector<1x2xf32>
    %546 = vector.extract_strided_slice %534 {offsets = [2, 0], sizes = [1, 2], strides = [1, 1]} : vector<3x2xf32> to vector<1x2xf32>
    %547 = arith.mulf %543, %546 : vector<1x2xf32>
    %548 = arith.addf %545, %547 : vector<1x2xf32>
    %549 = math.tanh %548 : vector<1x2xf32>
    %cst_90 = arith.constant 1.000000e+00 : f32
    %550 = vector.broadcast %cst_90 : f32 to vector<1x2xf32>
    %551 = arith.subf %550, %544 : vector<1x2xf32>
    %552 = arith.mulf %551, %549 : vector<1x2xf32>
    %553 = arith.mulf %544, %475 : vector<1x2xf32>
    %554 = arith.addf %552, %553 : vector<1x2xf32>
    %c8_i32_91 = arith.constant 8 : i32
    %555 = arith.cmpi slt, %c5_i32, %c8_i32_91 : i32
    %556 = arith.select %555, %502, %469 : vector<1x2xf32>
    %c1_i32_92 = arith.constant 1 : i32
    %557 = arith.cmpi sge, %c5_i32, %c1_i32_92 : i32
    %c8_i32_93 = arith.constant 8 : i32
    %558 = arith.cmpi sle, %c5_i32, %c8_i32_93 : i32
    %559 = arith.andi %557, %558 : i1
    %560 = arith.select %559, %528, %473 : vector<1x2xf32>
    %c2_i32_94 = arith.constant 2 : i32
    %561 = arith.cmpi sge, %c5_i32, %c2_i32_94 : i32
    %562 = arith.select %561, %554, %475 : vector<1x2xf32>
    %c6_i32 = arith.constant 6 : i32
    %c7_i32_95 = arith.constant 7 : i32
    %563 = arith.minsi %c6_i32, %c7_i32_95 : i32
    %564 = arith.index_cast %563 : i32 to index
    %c0_96 = arith.constant 0 : index
    %c0_97 = arith.constant 0 : index
    %565 = vector.load %arg0[%564, %c0_96, %c0_97] : memref<8x3x2xf32, #tpu.memory_space<vmem>>, vector<1x3x2xf32>
    %566 = vector.shape_cast %565 : vector<1x3x2xf32> to vector<3x2xf32>
    %567 = vector.broadcast %556 : vector<1x2xf32> to vector<3x2xf32>
    %568 = arith.mulf %567, %3 : vector<3x2xf32>
    %569 = arith.addf %568, %7 : vector<3x2xf32>
    %570 = vector.extract_strided_slice %566 {offsets = [0, 0], sizes = [2, 2], strides = [1, 1]} : vector<3x2xf32> to vector<2x2xf32>
    %571 = vector.extract_strided_slice %569 {offsets = [0, 0], sizes = [2, 2], strides = [1, 1]} : vector<3x2xf32> to vector<2x2xf32>
    %572 = arith.addf %570, %571 : vector<2x2xf32>
    %573 = arith.negf %572 : vector<2x2xf32>
    %574 = math.exp %573 : vector<2x2xf32>
    %cst_98 = arith.constant 1.000000e+00 : f32
    %575 = vector.broadcast %cst_98 : f32 to vector<2x2xf32>
    %576 = arith.addf %575, %574 : vector<2x2xf32>
    %577 = arith.divf %575, %576 : vector<2x2xf32>
    %578 = vector.extract_strided_slice %577 {offsets = [0, 0], sizes = [1, 2], strides = [1, 1]} : vector<2x2xf32> to vector<1x2xf32>
    %579 = vector.extract_strided_slice %577 {offsets = [1, 0], sizes = [1, 2], strides = [1, 1]} : vector<2x2xf32> to vector<1x2xf32>
    %580 = vector.extract_strided_slice %566 {offsets = [2, 0], sizes = [1, 2], strides = [1, 1]} : vector<3x2xf32> to vector<1x2xf32>
    %581 = vector.extract_strided_slice %569 {offsets = [2, 0], sizes = [1, 2], strides = [1, 1]} : vector<3x2xf32> to vector<1x2xf32>
    %582 = arith.mulf %578, %581 : vector<1x2xf32>
    %583 = arith.addf %580, %582 : vector<1x2xf32>
    %584 = math.tanh %583 : vector<1x2xf32>
    %cst_99 = arith.constant 1.000000e+00 : f32
    %585 = vector.broadcast %cst_99 : f32 to vector<1x2xf32>
    %586 = arith.subf %585, %579 : vector<1x2xf32>
    %587 = arith.mulf %586, %584 : vector<1x2xf32>
    %588 = arith.mulf %579, %556 : vector<1x2xf32>
    %589 = arith.addf %587, %588 : vector<1x2xf32>
    %590 = vector.broadcast %556 : vector<1x2xf32> to vector<3x2xf32>
    %591 = arith.mulf %590, %11 : vector<3x2xf32>
    %592 = arith.addf %591, %19 : vector<3x2xf32>
    %593 = vector.broadcast %560 : vector<1x2xf32> to vector<3x2xf32>
    %594 = arith.mulf %593, %15 : vector<3x2xf32>
    %595 = arith.addf %594, %23 : vector<3x2xf32>
    %596 = vector.extract_strided_slice %592 {offsets = [0, 0], sizes = [2, 2], strides = [1, 1]} : vector<3x2xf32> to vector<2x2xf32>
    %597 = vector.extract_strided_slice %595 {offsets = [0, 0], sizes = [2, 2], strides = [1, 1]} : vector<3x2xf32> to vector<2x2xf32>
    %598 = arith.addf %596, %597 : vector<2x2xf32>
    %599 = arith.negf %598 : vector<2x2xf32>
    %600 = math.exp %599 : vector<2x2xf32>
    %cst_100 = arith.constant 1.000000e+00 : f32
    %601 = vector.broadcast %cst_100 : f32 to vector<2x2xf32>
    %602 = arith.addf %601, %600 : vector<2x2xf32>
    %603 = arith.divf %601, %602 : vector<2x2xf32>
    %604 = vector.extract_strided_slice %603 {offsets = [0, 0], sizes = [1, 2], strides = [1, 1]} : vector<2x2xf32> to vector<1x2xf32>
    %605 = vector.extract_strided_slice %603 {offsets = [1, 0], sizes = [1, 2], strides = [1, 1]} : vector<2x2xf32> to vector<1x2xf32>
    %606 = vector.extract_strided_slice %592 {offsets = [2, 0], sizes = [1, 2], strides = [1, 1]} : vector<3x2xf32> to vector<1x2xf32>
    %607 = vector.extract_strided_slice %595 {offsets = [2, 0], sizes = [1, 2], strides = [1, 1]} : vector<3x2xf32> to vector<1x2xf32>
    %608 = arith.mulf %604, %607 : vector<1x2xf32>
    %609 = arith.addf %606, %608 : vector<1x2xf32>
    %610 = math.tanh %609 : vector<1x2xf32>
    %cst_101 = arith.constant 1.000000e+00 : f32
    %611 = vector.broadcast %cst_101 : f32 to vector<1x2xf32>
    %612 = arith.subf %611, %605 : vector<1x2xf32>
    %613 = arith.mulf %612, %610 : vector<1x2xf32>
    %614 = arith.mulf %605, %560 : vector<1x2xf32>
    %615 = arith.addf %613, %614 : vector<1x2xf32>
    %616 = vector.broadcast %560 : vector<1x2xf32> to vector<3x2xf32>
    %617 = arith.mulf %616, %27 : vector<3x2xf32>
    %618 = arith.addf %617, %35 : vector<3x2xf32>
    %619 = vector.broadcast %562 : vector<1x2xf32> to vector<3x2xf32>
    %620 = arith.mulf %619, %31 : vector<3x2xf32>
    %621 = arith.addf %620, %39 : vector<3x2xf32>
    %622 = vector.extract_strided_slice %618 {offsets = [0, 0], sizes = [2, 2], strides = [1, 1]} : vector<3x2xf32> to vector<2x2xf32>
    %623 = vector.extract_strided_slice %621 {offsets = [0, 0], sizes = [2, 2], strides = [1, 1]} : vector<3x2xf32> to vector<2x2xf32>
    %624 = arith.addf %622, %623 : vector<2x2xf32>
    %625 = arith.negf %624 : vector<2x2xf32>
    %626 = math.exp %625 : vector<2x2xf32>
    %cst_102 = arith.constant 1.000000e+00 : f32
    %627 = vector.broadcast %cst_102 : f32 to vector<2x2xf32>
    %628 = arith.addf %627, %626 : vector<2x2xf32>
    %629 = arith.divf %627, %628 : vector<2x2xf32>
    %630 = vector.extract_strided_slice %629 {offsets = [0, 0], sizes = [1, 2], strides = [1, 1]} : vector<2x2xf32> to vector<1x2xf32>
    %631 = vector.extract_strided_slice %629 {offsets = [1, 0], sizes = [1, 2], strides = [1, 1]} : vector<2x2xf32> to vector<1x2xf32>
    %632 = vector.extract_strided_slice %618 {offsets = [2, 0], sizes = [1, 2], strides = [1, 1]} : vector<3x2xf32> to vector<1x2xf32>
    %633 = vector.extract_strided_slice %621 {offsets = [2, 0], sizes = [1, 2], strides = [1, 1]} : vector<3x2xf32> to vector<1x2xf32>
    %634 = arith.mulf %630, %633 : vector<1x2xf32>
    %635 = arith.addf %632, %634 : vector<1x2xf32>
    %636 = math.tanh %635 : vector<1x2xf32>
    %cst_103 = arith.constant 1.000000e+00 : f32
    %637 = vector.broadcast %cst_103 : f32 to vector<1x2xf32>
    %638 = arith.subf %637, %631 : vector<1x2xf32>
    %639 = arith.mulf %638, %636 : vector<1x2xf32>
    %640 = arith.mulf %631, %562 : vector<1x2xf32>
    %641 = arith.addf %639, %640 : vector<1x2xf32>
    %c8_i32_104 = arith.constant 8 : i32
    %642 = arith.cmpi slt, %c6_i32, %c8_i32_104 : i32
    %643 = arith.select %642, %589, %556 : vector<1x2xf32>
    %c1_i32_105 = arith.constant 1 : i32
    %644 = arith.cmpi sge, %c6_i32, %c1_i32_105 : i32
    %c8_i32_106 = arith.constant 8 : i32
    %645 = arith.cmpi sle, %c6_i32, %c8_i32_106 : i32
    %646 = arith.andi %644, %645 : i1
    %647 = arith.select %646, %615, %560 : vector<1x2xf32>
    %c2_i32_107 = arith.constant 2 : i32
    %648 = arith.cmpi sge, %c6_i32, %c2_i32_107 : i32
    %649 = arith.select %648, %641, %562 : vector<1x2xf32>
    %c7_i32_108 = arith.constant 7 : i32
    %c7_i32_109 = arith.constant 7 : i32
    %650 = arith.minsi %c7_i32_108, %c7_i32_109 : i32
    %651 = arith.index_cast %650 : i32 to index
    %c0_110 = arith.constant 0 : index
    %c0_111 = arith.constant 0 : index
    %652 = vector.load %arg0[%651, %c0_110, %c0_111] : memref<8x3x2xf32, #tpu.memory_space<vmem>>, vector<1x3x2xf32>
    %653 = vector.shape_cast %652 : vector<1x3x2xf32> to vector<3x2xf32>
    %654 = vector.broadcast %643 : vector<1x2xf32> to vector<3x2xf32>
    %655 = arith.mulf %654, %3 : vector<3x2xf32>
    %656 = arith.addf %655, %7 : vector<3x2xf32>
    %657 = vector.extract_strided_slice %653 {offsets = [0, 0], sizes = [2, 2], strides = [1, 1]} : vector<3x2xf32> to vector<2x2xf32>
    %658 = vector.extract_strided_slice %656 {offsets = [0, 0], sizes = [2, 2], strides = [1, 1]} : vector<3x2xf32> to vector<2x2xf32>
    %659 = arith.addf %657, %658 : vector<2x2xf32>
    %660 = arith.negf %659 : vector<2x2xf32>
    %661 = math.exp %660 : vector<2x2xf32>
    %cst_112 = arith.constant 1.000000e+00 : f32
    %662 = vector.broadcast %cst_112 : f32 to vector<2x2xf32>
    %663 = arith.addf %662, %661 : vector<2x2xf32>
    %664 = arith.divf %662, %663 : vector<2x2xf32>
    %665 = vector.extract_strided_slice %664 {offsets = [0, 0], sizes = [1, 2], strides = [1, 1]} : vector<2x2xf32> to vector<1x2xf32>
    %666 = vector.extract_strided_slice %664 {offsets = [1, 0], sizes = [1, 2], strides = [1, 1]} : vector<2x2xf32> to vector<1x2xf32>
    %667 = vector.extract_strided_slice %653 {offsets = [2, 0], sizes = [1, 2], strides = [1, 1]} : vector<3x2xf32> to vector<1x2xf32>
    %668 = vector.extract_strided_slice %656 {offsets = [2, 0], sizes = [1, 2], strides = [1, 1]} : vector<3x2xf32> to vector<1x2xf32>
    %669 = arith.mulf %665, %668 : vector<1x2xf32>
    %670 = arith.addf %667, %669 : vector<1x2xf32>
    %671 = math.tanh %670 : vector<1x2xf32>
    %cst_113 = arith.constant 1.000000e+00 : f32
    %672 = vector.broadcast %cst_113 : f32 to vector<1x2xf32>
    %673 = arith.subf %672, %666 : vector<1x2xf32>
    %674 = arith.mulf %673, %671 : vector<1x2xf32>
    %675 = arith.mulf %666, %643 : vector<1x2xf32>
    %676 = arith.addf %674, %675 : vector<1x2xf32>
    %677 = vector.broadcast %643 : vector<1x2xf32> to vector<3x2xf32>
    %678 = arith.mulf %677, %11 : vector<3x2xf32>
    %679 = arith.addf %678, %19 : vector<3x2xf32>
    %680 = vector.broadcast %647 : vector<1x2xf32> to vector<3x2xf32>
    %681 = arith.mulf %680, %15 : vector<3x2xf32>
    %682 = arith.addf %681, %23 : vector<3x2xf32>
    %683 = vector.extract_strided_slice %679 {offsets = [0, 0], sizes = [2, 2], strides = [1, 1]} : vector<3x2xf32> to vector<2x2xf32>
    %684 = vector.extract_strided_slice %682 {offsets = [0, 0], sizes = [2, 2], strides = [1, 1]} : vector<3x2xf32> to vector<2x2xf32>
    %685 = arith.addf %683, %684 : vector<2x2xf32>
    %686 = arith.negf %685 : vector<2x2xf32>
    %687 = math.exp %686 : vector<2x2xf32>
    %cst_114 = arith.constant 1.000000e+00 : f32
    %688 = vector.broadcast %cst_114 : f32 to vector<2x2xf32>
    %689 = arith.addf %688, %687 : vector<2x2xf32>
    %690 = arith.divf %688, %689 : vector<2x2xf32>
    %691 = vector.extract_strided_slice %690 {offsets = [0, 0], sizes = [1, 2], strides = [1, 1]} : vector<2x2xf32> to vector<1x2xf32>
    %692 = vector.extract_strided_slice %690 {offsets = [1, 0], sizes = [1, 2], strides = [1, 1]} : vector<2x2xf32> to vector<1x2xf32>
    %693 = vector.extract_strided_slice %679 {offsets = [2, 0], sizes = [1, 2], strides = [1, 1]} : vector<3x2xf32> to vector<1x2xf32>
    %694 = vector.extract_strided_slice %682 {offsets = [2, 0], sizes = [1, 2], strides = [1, 1]} : vector<3x2xf32> to vector<1x2xf32>
    %695 = arith.mulf %691, %694 : vector<1x2xf32>
    %696 = arith.addf %693, %695 : vector<1x2xf32>
    %697 = math.tanh %696 : vector<1x2xf32>
    %cst_115 = arith.constant 1.000000e+00 : f32
    %698 = vector.broadcast %cst_115 : f32 to vector<1x2xf32>
    %699 = arith.subf %698, %692 : vector<1x2xf32>
    %700 = arith.mulf %699, %697 : vector<1x2xf32>
    %701 = arith.mulf %692, %647 : vector<1x2xf32>
    %702 = arith.addf %700, %701 : vector<1x2xf32>
    %703 = vector.broadcast %647 : vector<1x2xf32> to vector<3x2xf32>
    %704 = arith.mulf %703, %27 : vector<3x2xf32>
    %705 = arith.addf %704, %35 : vector<3x2xf32>
    %706 = vector.broadcast %649 : vector<1x2xf32> to vector<3x2xf32>
    %707 = arith.mulf %706, %31 : vector<3x2xf32>
    %708 = arith.addf %707, %39 : vector<3x2xf32>
    %709 = vector.extract_strided_slice %705 {offsets = [0, 0], sizes = [2, 2], strides = [1, 1]} : vector<3x2xf32> to vector<2x2xf32>
    %710 = vector.extract_strided_slice %708 {offsets = [0, 0], sizes = [2, 2], strides = [1, 1]} : vector<3x2xf32> to vector<2x2xf32>
    %711 = arith.addf %709, %710 : vector<2x2xf32>
    %712 = arith.negf %711 : vector<2x2xf32>
    %713 = math.exp %712 : vector<2x2xf32>
    %cst_116 = arith.constant 1.000000e+00 : f32
    %714 = vector.broadcast %cst_116 : f32 to vector<2x2xf32>
    %715 = arith.addf %714, %713 : vector<2x2xf32>
    %716 = arith.divf %714, %715 : vector<2x2xf32>
    %717 = vector.extract_strided_slice %716 {offsets = [0, 0], sizes = [1, 2], strides = [1, 1]} : vector<2x2xf32> to vector<1x2xf32>
    %718 = vector.extract_strided_slice %716 {offsets = [1, 0], sizes = [1, 2], strides = [1, 1]} : vector<2x2xf32> to vector<1x2xf32>
    %719 = vector.extract_strided_slice %705 {offsets = [2, 0], sizes = [1, 2], strides = [1, 1]} : vector<3x2xf32> to vector<1x2xf32>
    %720 = vector.extract_strided_slice %708 {offsets = [2, 0], sizes = [1, 2], strides = [1, 1]} : vector<3x2xf32> to vector<1x2xf32>
    %721 = arith.mulf %717, %720 : vector<1x2xf32>
    %722 = arith.addf %719, %721 : vector<1x2xf32>
    %723 = math.tanh %722 : vector<1x2xf32>
    %cst_117 = arith.constant 1.000000e+00 : f32
    %724 = vector.broadcast %cst_117 : f32 to vector<1x2xf32>
    %725 = arith.subf %724, %718 : vector<1x2xf32>
    %726 = arith.mulf %725, %723 : vector<1x2xf32>
    %727 = arith.mulf %718, %649 : vector<1x2xf32>
    %728 = arith.addf %726, %727 : vector<1x2xf32>
    %c8_i32_118 = arith.constant 8 : i32
    %729 = arith.cmpi slt, %c7_i32_108, %c8_i32_118 : i32
    %730 = arith.select %729, %676, %643 : vector<1x2xf32>
    %c1_i32_119 = arith.constant 1 : i32
    %731 = arith.cmpi sge, %c7_i32_108, %c1_i32_119 : i32
    %c8_i32_120 = arith.constant 8 : i32
    %732 = arith.cmpi sle, %c7_i32_108, %c8_i32_120 : i32
    %733 = arith.andi %731, %732 : i1
    %734 = arith.select %733, %702, %647 : vector<1x2xf32>
    %c2_i32_121 = arith.constant 2 : i32
    %735 = arith.cmpi sge, %c7_i32_108, %c2_i32_121 : i32
    %736 = arith.select %735, %728, %649 : vector<1x2xf32>
    %c8_i32_122 = arith.constant 8 : i32
    %c7_i32_123 = arith.constant 7 : i32
    %737 = arith.minsi %c8_i32_122, %c7_i32_123 : i32
    %738 = arith.index_cast %737 : i32 to index
    %c0_124 = arith.constant 0 : index
    %c0_125 = arith.constant 0 : index
    %739 = vector.load %arg0[%738, %c0_124, %c0_125] : memref<8x3x2xf32, #tpu.memory_space<vmem>>, vector<1x3x2xf32>
    %740 = vector.shape_cast %739 : vector<1x3x2xf32> to vector<3x2xf32>
    %741 = vector.broadcast %730 : vector<1x2xf32> to vector<3x2xf32>
    %742 = arith.mulf %741, %3 : vector<3x2xf32>
    %743 = arith.addf %742, %7 : vector<3x2xf32>
    %744 = vector.extract_strided_slice %740 {offsets = [0, 0], sizes = [2, 2], strides = [1, 1]} : vector<3x2xf32> to vector<2x2xf32>
    %745 = vector.extract_strided_slice %743 {offsets = [0, 0], sizes = [2, 2], strides = [1, 1]} : vector<3x2xf32> to vector<2x2xf32>
    %746 = arith.addf %744, %745 : vector<2x2xf32>
    %747 = arith.negf %746 : vector<2x2xf32>
    %748 = math.exp %747 : vector<2x2xf32>
    %cst_126 = arith.constant 1.000000e+00 : f32
    %749 = vector.broadcast %cst_126 : f32 to vector<2x2xf32>
    %750 = arith.addf %749, %748 : vector<2x2xf32>
    %751 = arith.divf %749, %750 : vector<2x2xf32>
    %752 = vector.extract_strided_slice %751 {offsets = [0, 0], sizes = [1, 2], strides = [1, 1]} : vector<2x2xf32> to vector<1x2xf32>
    %753 = vector.extract_strided_slice %751 {offsets = [1, 0], sizes = [1, 2], strides = [1, 1]} : vector<2x2xf32> to vector<1x2xf32>
    %754 = vector.extract_strided_slice %740 {offsets = [2, 0], sizes = [1, 2], strides = [1, 1]} : vector<3x2xf32> to vector<1x2xf32>
    %755 = vector.extract_strided_slice %743 {offsets = [2, 0], sizes = [1, 2], strides = [1, 1]} : vector<3x2xf32> to vector<1x2xf32>
    %756 = arith.mulf %752, %755 : vector<1x2xf32>
    %757 = arith.addf %754, %756 : vector<1x2xf32>
    %758 = math.tanh %757 : vector<1x2xf32>
    %cst_127 = arith.constant 1.000000e+00 : f32
    %759 = vector.broadcast %cst_127 : f32 to vector<1x2xf32>
    %760 = arith.subf %759, %753 : vector<1x2xf32>
    %761 = arith.mulf %760, %758 : vector<1x2xf32>
    %762 = arith.mulf %753, %730 : vector<1x2xf32>
    %763 = arith.addf %761, %762 : vector<1x2xf32>
    %764 = vector.broadcast %730 : vector<1x2xf32> to vector<3x2xf32>
    %765 = arith.mulf %764, %11 : vector<3x2xf32>
    %766 = arith.addf %765, %19 : vector<3x2xf32>
    %767 = vector.broadcast %734 : vector<1x2xf32> to vector<3x2xf32>
    %768 = arith.mulf %767, %15 : vector<3x2xf32>
    %769 = arith.addf %768, %23 : vector<3x2xf32>
    %770 = vector.extract_strided_slice %766 {offsets = [0, 0], sizes = [2, 2], strides = [1, 1]} : vector<3x2xf32> to vector<2x2xf32>
    %771 = vector.extract_strided_slice %769 {offsets = [0, 0], sizes = [2, 2], strides = [1, 1]} : vector<3x2xf32> to vector<2x2xf32>
    %772 = arith.addf %770, %771 : vector<2x2xf32>
    %773 = arith.negf %772 : vector<2x2xf32>
    %774 = math.exp %773 : vector<2x2xf32>
    %cst_128 = arith.constant 1.000000e+00 : f32
    %775 = vector.broadcast %cst_128 : f32 to vector<2x2xf32>
    %776 = arith.addf %775, %774 : vector<2x2xf32>
    %777 = arith.divf %775, %776 : vector<2x2xf32>
    %778 = vector.extract_strided_slice %777 {offsets = [0, 0], sizes = [1, 2], strides = [1, 1]} : vector<2x2xf32> to vector<1x2xf32>
    %779 = vector.extract_strided_slice %777 {offsets = [1, 0], sizes = [1, 2], strides = [1, 1]} : vector<2x2xf32> to vector<1x2xf32>
    %780 = vector.extract_strided_slice %766 {offsets = [2, 0], sizes = [1, 2], strides = [1, 1]} : vector<3x2xf32> to vector<1x2xf32>
    %781 = vector.extract_strided_slice %769 {offsets = [2, 0], sizes = [1, 2], strides = [1, 1]} : vector<3x2xf32> to vector<1x2xf32>
    %782 = arith.mulf %778, %781 : vector<1x2xf32>
    %783 = arith.addf %780, %782 : vector<1x2xf32>
    %784 = math.tanh %783 : vector<1x2xf32>
    %cst_129 = arith.constant 1.000000e+00 : f32
    %785 = vector.broadcast %cst_129 : f32 to vector<1x2xf32>
    %786 = arith.subf %785, %779 : vector<1x2xf32>
    %787 = arith.mulf %786, %784 : vector<1x2xf32>
    %788 = arith.mulf %779, %734 : vector<1x2xf32>
    %789 = arith.addf %787, %788 : vector<1x2xf32>
    %790 = vector.broadcast %734 : vector<1x2xf32> to vector<3x2xf32>
    %791 = arith.mulf %790, %27 : vector<3x2xf32>
    %792 = arith.addf %791, %35 : vector<3x2xf32>
    %793 = vector.broadcast %736 : vector<1x2xf32> to vector<3x2xf32>
    %794 = arith.mulf %793, %31 : vector<3x2xf32>
    %795 = arith.addf %794, %39 : vector<3x2xf32>
    %796 = vector.extract_strided_slice %792 {offsets = [0, 0], sizes = [2, 2], strides = [1, 1]} : vector<3x2xf32> to vector<2x2xf32>
    %797 = vector.extract_strided_slice %795 {offsets = [0, 0], sizes = [2, 2], strides = [1, 1]} : vector<3x2xf32> to vector<2x2xf32>
    %798 = arith.addf %796, %797 : vector<2x2xf32>
    %799 = arith.negf %798 : vector<2x2xf32>
    %800 = math.exp %799 : vector<2x2xf32>
    %cst_130 = arith.constant 1.000000e+00 : f32
    %801 = vector.broadcast %cst_130 : f32 to vector<2x2xf32>
    %802 = arith.addf %801, %800 : vector<2x2xf32>
    %803 = arith.divf %801, %802 : vector<2x2xf32>
    %804 = vector.extract_strided_slice %803 {offsets = [0, 0], sizes = [1, 2], strides = [1, 1]} : vector<2x2xf32> to vector<1x2xf32>
    %805 = vector.extract_strided_slice %803 {offsets = [1, 0], sizes = [1, 2], strides = [1, 1]} : vector<2x2xf32> to vector<1x2xf32>
    %806 = vector.extract_strided_slice %792 {offsets = [2, 0], sizes = [1, 2], strides = [1, 1]} : vector<3x2xf32> to vector<1x2xf32>
    %807 = vector.extract_strided_slice %795 {offsets = [2, 0], sizes = [1, 2], strides = [1, 1]} : vector<3x2xf32> to vector<1x2xf32>
    %808 = arith.mulf %804, %807 : vector<1x2xf32>
    %809 = arith.addf %806, %808 : vector<1x2xf32>
    %810 = math.tanh %809 : vector<1x2xf32>
    %cst_131 = arith.constant 1.000000e+00 : f32
    %811 = vector.broadcast %cst_131 : f32 to vector<1x2xf32>
    %812 = arith.subf %811, %805 : vector<1x2xf32>
    %813 = arith.mulf %812, %810 : vector<1x2xf32>
    %814 = arith.mulf %805, %736 : vector<1x2xf32>
    %815 = arith.addf %813, %814 : vector<1x2xf32>
    %c8_i32_132 = arith.constant 8 : i32
    %816 = arith.cmpi slt, %c8_i32_122, %c8_i32_132 : i32
    %817 = arith.select %816, %763, %730 : vector<1x2xf32>
    %c1_i32_133 = arith.constant 1 : i32
    %818 = arith.cmpi sge, %c8_i32_122, %c1_i32_133 : i32
    %c8_i32_134 = arith.constant 8 : i32
    %819 = arith.cmpi sle, %c8_i32_122, %c8_i32_134 : i32
    %820 = arith.andi %818, %819 : i1
    %821 = arith.select %820, %789, %734 : vector<1x2xf32>
    %c2_i32_135 = arith.constant 2 : i32
    %822 = arith.cmpi sge, %c8_i32_122, %c2_i32_135 : i32
    %823 = arith.select %822, %815, %736 : vector<1x2xf32>
    %c9_i32 = arith.constant 9 : i32
    %c7_i32_136 = arith.constant 7 : i32
    %824 = arith.minsi %c9_i32, %c7_i32_136 : i32
    %825 = arith.index_cast %824 : i32 to index
    %c0_137 = arith.constant 0 : index
    %c0_138 = arith.constant 0 : index
    %826 = vector.load %arg0[%825, %c0_137, %c0_138] : memref<8x3x2xf32, #tpu.memory_space<vmem>>, vector<1x3x2xf32>
    %827 = vector.shape_cast %826 : vector<1x3x2xf32> to vector<3x2xf32>
    %828 = vector.broadcast %817 : vector<1x2xf32> to vector<3x2xf32>
    %829 = arith.mulf %828, %3 : vector<3x2xf32>
    %830 = arith.addf %829, %7 : vector<3x2xf32>
    %831 = vector.extract_strided_slice %827 {offsets = [0, 0], sizes = [2, 2], strides = [1, 1]} : vector<3x2xf32> to vector<2x2xf32>
    %832 = vector.extract_strided_slice %830 {offsets = [0, 0], sizes = [2, 2], strides = [1, 1]} : vector<3x2xf32> to vector<2x2xf32>
    %833 = arith.addf %831, %832 : vector<2x2xf32>
    %834 = arith.negf %833 : vector<2x2xf32>
    %835 = math.exp %834 : vector<2x2xf32>
    %cst_139 = arith.constant 1.000000e+00 : f32
    %836 = vector.broadcast %cst_139 : f32 to vector<2x2xf32>
    %837 = arith.addf %836, %835 : vector<2x2xf32>
    %838 = arith.divf %836, %837 : vector<2x2xf32>
    %839 = vector.extract_strided_slice %838 {offsets = [0, 0], sizes = [1, 2], strides = [1, 1]} : vector<2x2xf32> to vector<1x2xf32>
    %840 = vector.extract_strided_slice %838 {offsets = [1, 0], sizes = [1, 2], strides = [1, 1]} : vector<2x2xf32> to vector<1x2xf32>
    %841 = vector.extract_strided_slice %827 {offsets = [2, 0], sizes = [1, 2], strides = [1, 1]} : vector<3x2xf32> to vector<1x2xf32>
    %842 = vector.extract_strided_slice %830 {offsets = [2, 0], sizes = [1, 2], strides = [1, 1]} : vector<3x2xf32> to vector<1x2xf32>
    %843 = arith.mulf %839, %842 : vector<1x2xf32>
    %844 = arith.addf %841, %843 : vector<1x2xf32>
    %845 = math.tanh %844 : vector<1x2xf32>
    %cst_140 = arith.constant 1.000000e+00 : f32
    %846 = vector.broadcast %cst_140 : f32 to vector<1x2xf32>
    %847 = arith.subf %846, %840 : vector<1x2xf32>
    %848 = arith.mulf %847, %845 : vector<1x2xf32>
    %849 = arith.mulf %840, %817 : vector<1x2xf32>
    %850 = arith.addf %848, %849 : vector<1x2xf32>
    %851 = vector.broadcast %817 : vector<1x2xf32> to vector<3x2xf32>
    %852 = arith.mulf %851, %11 : vector<3x2xf32>
    %853 = arith.addf %852, %19 : vector<3x2xf32>
    %854 = vector.broadcast %821 : vector<1x2xf32> to vector<3x2xf32>
    %855 = arith.mulf %854, %15 : vector<3x2xf32>
    %856 = arith.addf %855, %23 : vector<3x2xf32>
    %857 = vector.extract_strided_slice %853 {offsets = [0, 0], sizes = [2, 2], strides = [1, 1]} : vector<3x2xf32> to vector<2x2xf32>
    %858 = vector.extract_strided_slice %856 {offsets = [0, 0], sizes = [2, 2], strides = [1, 1]} : vector<3x2xf32> to vector<2x2xf32>
    %859 = arith.addf %857, %858 : vector<2x2xf32>
    %860 = arith.negf %859 : vector<2x2xf32>
    %861 = math.exp %860 : vector<2x2xf32>
    %cst_141 = arith.constant 1.000000e+00 : f32
    %862 = vector.broadcast %cst_141 : f32 to vector<2x2xf32>
    %863 = arith.addf %862, %861 : vector<2x2xf32>
    %864 = arith.divf %862, %863 : vector<2x2xf32>
    %865 = vector.extract_strided_slice %864 {offsets = [0, 0], sizes = [1, 2], strides = [1, 1]} : vector<2x2xf32> to vector<1x2xf32>
    %866 = vector.extract_strided_slice %864 {offsets = [1, 0], sizes = [1, 2], strides = [1, 1]} : vector<2x2xf32> to vector<1x2xf32>
    %867 = vector.extract_strided_slice %853 {offsets = [2, 0], sizes = [1, 2], strides = [1, 1]} : vector<3x2xf32> to vector<1x2xf32>
    %868 = vector.extract_strided_slice %856 {offsets = [2, 0], sizes = [1, 2], strides = [1, 1]} : vector<3x2xf32> to vector<1x2xf32>
    %869 = arith.mulf %865, %868 : vector<1x2xf32>
    %870 = arith.addf %867, %869 : vector<1x2xf32>
    %871 = math.tanh %870 : vector<1x2xf32>
    %cst_142 = arith.constant 1.000000e+00 : f32
    %872 = vector.broadcast %cst_142 : f32 to vector<1x2xf32>
    %873 = arith.subf %872, %866 : vector<1x2xf32>
    %874 = arith.mulf %873, %871 : vector<1x2xf32>
    %875 = arith.mulf %866, %821 : vector<1x2xf32>
    %876 = arith.addf %874, %875 : vector<1x2xf32>
    %877 = vector.broadcast %821 : vector<1x2xf32> to vector<3x2xf32>
    %878 = arith.mulf %877, %27 : vector<3x2xf32>
    %879 = arith.addf %878, %35 : vector<3x2xf32>
    %880 = vector.broadcast %823 : vector<1x2xf32> to vector<3x2xf32>
    %881 = arith.mulf %880, %31 : vector<3x2xf32>
    %882 = arith.addf %881, %39 : vector<3x2xf32>
    %883 = vector.extract_strided_slice %879 {offsets = [0, 0], sizes = [2, 2], strides = [1, 1]} : vector<3x2xf32> to vector<2x2xf32>
    %884 = vector.extract_strided_slice %882 {offsets = [0, 0], sizes = [2, 2], strides = [1, 1]} : vector<3x2xf32> to vector<2x2xf32>
    %885 = arith.addf %883, %884 : vector<2x2xf32>
    %886 = arith.negf %885 : vector<2x2xf32>
    %887 = math.exp %886 : vector<2x2xf32>
    %cst_143 = arith.constant 1.000000e+00 : f32
    %888 = vector.broadcast %cst_143 : f32 to vector<2x2xf32>
    %889 = arith.addf %888, %887 : vector<2x2xf32>
    %890 = arith.divf %888, %889 : vector<2x2xf32>
    %891 = vector.extract_strided_slice %890 {offsets = [0, 0], sizes = [1, 2], strides = [1, 1]} : vector<2x2xf32> to vector<1x2xf32>
    %892 = vector.extract_strided_slice %890 {offsets = [1, 0], sizes = [1, 2], strides = [1, 1]} : vector<2x2xf32> to vector<1x2xf32>
    %893 = vector.extract_strided_slice %879 {offsets = [2, 0], sizes = [1, 2], strides = [1, 1]} : vector<3x2xf32> to vector<1x2xf32>
    %894 = vector.extract_strided_slice %882 {offsets = [2, 0], sizes = [1, 2], strides = [1, 1]} : vector<3x2xf32> to vector<1x2xf32>
    %895 = arith.mulf %891, %894 : vector<1x2xf32>
    %896 = arith.addf %893, %895 : vector<1x2xf32>
    %897 = math.tanh %896 : vector<1x2xf32>
    %cst_144 = arith.constant 1.000000e+00 : f32
    %898 = vector.broadcast %cst_144 : f32 to vector<1x2xf32>
    %899 = arith.subf %898, %892 : vector<1x2xf32>
    %900 = arith.mulf %899, %897 : vector<1x2xf32>
    %901 = arith.mulf %892, %823 : vector<1x2xf32>
    %902 = arith.addf %900, %901 : vector<1x2xf32>
    %c8_i32_145 = arith.constant 8 : i32
    %903 = arith.cmpi slt, %c9_i32, %c8_i32_145 : i32
    %904 = arith.select %903, %850, %817 : vector<1x2xf32>
    %c1_i32_146 = arith.constant 1 : i32
    %905 = arith.cmpi sge, %c9_i32, %c1_i32_146 : i32
    %c8_i32_147 = arith.constant 8 : i32
    %906 = arith.cmpi sle, %c9_i32, %c8_i32_147 : i32
    %907 = arith.andi %905, %906 : i1
    %908 = arith.select %907, %876, %821 : vector<1x2xf32>
    %c2_i32_148 = arith.constant 2 : i32
    %909 = arith.cmpi sge, %c9_i32, %c2_i32_148 : i32
    %910 = arith.select %909, %902, %823 : vector<1x2xf32>
    %c10_i32 = arith.constant 10 : i32
    %c0_149 = arith.constant 0 : index
    %c0_150 = arith.constant 0 : index
    %911 = vector.load %arg2[%c0_149, %c0_150] : memref<1x2xf32, #tpu.memory_space<vmem>>, vector<1x2xf32>
    tpu.vector_store %arg2[%c0_149, %c0_150], %910 {strides = array<i32>} : memref<1x2xf32, #tpu.memory_space<vmem>>, vector<1x2xf32>,
    return
  }
}

</mosaic_0001>

<bundles_post_ra>
// kernel: tpu_custom_call.1
= control target key start
LH: loop header
LB: loop body
LE: loop exit
PB: predicated region body
PF: predicated region fallthrough
CT: control target
= control target key end

     0   :  { %v1050_v1 = vmov 0   ;;  %s1322_s0 = inlined_call_operand.vmem [shape: f32[8,3,2], index: 0, kind: input, shape index: {}]   ;;  %s1323_s1 = inlined_call_operand.vmem [shape: f32[12,3,1], index: 1, kind: input, shape index: {}]   ;;  %s1324_s2 = inlined_call_operand.hbm [shape: f32[1,2], index: 2, kind: output, shape index: {}]  }
   0x1   :  { %v837_v0 = vld [vmem:[%s1323_s1 + $0x4] sm:$0x7]  ;;  %880 = vset.pattern.permute.xlu0 %v1050_v1  ;;  %881 = vset.pattern.permute.xlu1 %v1050_v1  ;;  %v839_v2 = vld [vmem:[%s1323_s1 + $0x10] sm:$0x7]  ;;  %v838_v3 = vld [vmem:[%s1323_s1 + $0xc] sm:$0x7] }
   0x2   :  { %16 = vperm.xlu0 %880, %v837_v0   ;;  %30 = vperm.xlu1 %881, %v839_v2   ;;  %v840_v4 = vld [vmem:[%s1323_s1 + $0x14] sm:$0x7]  ;;  %v841_v5 = vld [vmem:[%s1323_s1 + $0x18] sm:$0x7] }
   0x6   :  { %23 = vperm.xlu0 %880, %v838_v3   ;;  %37 = vperm.xlu1 %881, %v840_v4  }
   0x7   :  { %7 = vsyncpa [#allocation3], 0  ;;  %v842_v6 = vld [vmem:[%s1323_s1 + $0x1c] sm:$0x7]  ;;  %v843_v7 = vld [vmem:[%s1323_s1 + $0x20] sm:$0x7]  ;;  %v110_v25 = vlaneseq }
   0x8   :  { %v844_v8 = vld [vmem:[%s1323_s1 + $0x24] sm:$0x7]  ;;  %v845_v9 = vld [vmem:[%s1323_s1 + $0x28] sm:$0x7]  ;;  %v846_v10 = vld [vmem:[%s1323_s1 + $0x2c] sm:$0x7] }
   0x9   :  { %v82_v13 = vld [vmem:[%s1322_s0] sm:$0x7]  ;;  %v111_v27 = vshrl.u32 %v110_v25, 7  ;;  %v848_v40 = vld [vmem:[%s1322_s0 + $0x4] sm:$0x7]  ;;  %vm821_vm0 = vcmask 9217  }
   0xa   :  { %44 = vperm.xlu0 %880, %v841_v5   ;;  %51 = vperm.xlu1 %881, %v842_v6  }
   0xb   :  { %v1108_v31 = vsub.s32 1, %v111_v27 }
   0xe   :  { %58 = vperm.xlu0 %880, %v843_v7   ;;  %65 = vperm.xlu1 %881, %v844_v8  }
  0x12   :  { %72 = vperm.xlu0 %880, %v845_v9   ;;  %79 = vperm.xlu1 %881, %v846_v10  }
  0x81   :  { %v1097_v11 = vpop.permute.xlu0 %16  ;;  %v1106_v26 = vpop.permute.xlu1 %30 }
  0x82   :  { %v83_v12 = vmul.f32 0.0, %v1097_v11 }
  0x85   :  { %v1103_v14 = vpop.permute.xlu0 %23  ;;  %v1110_v34 = vpop.permute.xlu1 %37 }
  0x86   :  { %v84_v15 = vadd.f32 %v83_v12, %v1103_v14  ;;  %v141_v37 = vmul.f32 0.0, %v1110_v34 }
  0x88   :  { %v85_v16 = vadd.f32 %v84_v15, %v82_v13  ;;  %v93_v20 = vrot.slane %v84_v15, 2 }
  0x89   :  { %v1119_v41 = vpop.permute.xlu0 %44  ;;  %v1121_v42 = vpop.permute.xlu1 %51 }
  0x8a   :  { %v847_v17 = vmul.f32 -1.442695, %v85_v16  ;;  %v142_v45 = vadd.f32 %v141_v37, %v1121_v42 }
  0x8c   :  { %882 = vpow2.f32 %v847_v17  ;;  %v151_v56 = vrot.slane %v142_v45, 2 }
  0x8d   :  { %v1126_v8 = vpop.permute.xlu1 %65 }
  0x96   :  { %v883_v18 = vpop.eup %882 }
  0x97   :  { %v89_v19 = vadd.f32 1.0, %v883_v18  ;;  %v230_v18 = vmul.f32 0.0, %v1126_v8 }
  0x99   :  { %884 = vrcp.f32 %v89_v19 }
  0xa3   :  { %v885_v21 = vpop.eup %884 }
  0xa4   :  { %v95_v22 = vmul.f32 %v885_v21, %v93_v20  ;;  %v101_v29 = vsub.f32 1.0, %v885_v21  ;;  %v106_v33 = vmul.f32 0.0, %v885_v21  ;;  %v1138_v21 = vpop.permute.xlu1 %79 }
  0xa6   :  { %v97_v23 = vrot.slane %v95_v22, 6  ;;  %v851_v22 = vld [vmem:[%s1322_s0 + $0x8] sm:$0x7] }
  0xa8   :  { %v99_v24 = vadd.f32 %v97_v23, %v82_v13  ;;  %v1128_v13 = vpop.permute.xlu0 %58 }
  0xaa   :  { %886 = vtanh.f32 %v99_v24 }
  0xac   :  { %v1146_v27 = vpop.permute.xlu0 %72 }
  0xb4   :  { %v887_v28 = vpop.eup %886 }
  0xb5   :  { %v103_v30 = vrot.slane %v887_v28, 1 }
  0xb7   :  { %v105_v32 = vmul.f32 %v103_v30, %v101_v29 }
  0xb9   :  { %v107_v35 = vadd.f32 %v106_v33, %v105_v32  ;;  %v231_v32 = vadd.f32 %v230_v18, %v1138_v21 }
  0xbb   :  { %v113_v36 = vrot.slane %v107_v35, %v1108_v31 }
  0xbd   :  { %v114_v38 = vmul.f32 %v113_v36, %v1097_v11  ;;  %v139_v39 = vmul.f32 %v113_v36, %v1106_v26 }
  0xbf   :  { %v115_v43 = vadd.f32 %v114_v38, %v1103_v14  ;;  %v140_v44 = vadd.f32 %v139_v39, %v1119_v41 }
  0xc1   :  { %v116_v46 = vadd.f32 %v848_v40, %v115_v43  ;;  %v143_v47 = vadd.f32 %v142_v45, %v140_v44  ;;  %v124_v54 = vrot.slane %v115_v43, 2 }
  0xc3   :  { %v849_v48 = vmul.f32 -1.442695, %v116_v46  ;;  %v850_v49 = vmul.f32 -1.442695, %v143_v47 }
  0xc5   :  { %888 = vpow2.f32 %v849_v48 }
  0xc6   :  { %890 = vpow2.f32 %v850_v49 }
  0xcf   :  { %v889_v50 = vpop.eup %888 }
  0xd0   :  { %v891_v51 = vpop.eup %890  ;;  %v120_v52 = vadd.f32 1.0, %v889_v50 }
  0xd1   :  { %v147_v53 = vadd.f32 1.0, %v891_v51 }
  0xd2   :  { %892 = vrcp.f32 %v120_v52 }
  0xd3   :  { %894 = vrcp.f32 %v147_v53  ;;  %v240_v53 = vrot.slane %v231_v32, 2 }
  0xdc   :  { %v893_v55 = vpop.eup %892 }
  0xdd   :  { %v895_v57 = vpop.eup %894  ;;  %v126_v58 = vmul.f32 %v893_v55, %v124_v54  ;;  %v132_v2 = vsub.f32 1.0, %v893_v55  ;;  %v137_v7 = vmul.f32 %v893_v55, %v107_v35 }
  0xde   :  { %v153_v59 = vmul.f32 %v895_v57, %v151_v56  ;;  %v159_v4 = vsub.f32 1.0, %v895_v57  ;;  %v164_v10 = vmul.f32 0.0, %v895_v57 }
  0xdf   :  { %v128_v60 = vrot.slane %v126_v58, 6 }
  0xe0   :  { %v155_v61 = vrot.slane %v153_v59, 6 }
  0xe1   :  { %v130_v62 = vadd.f32 %v848_v40, %v128_v60 }
  0xe2   :  { %v157_v63 = vadd.f32 %v155_v61, %v140_v44 }
  0xe3   :  { %896 = vtanh.f32 %v130_v62 }
  0xe4   :  { %898 = vtanh.f32 %v157_v63 }
  0xed   :  { %v897_v0 = vpop.eup %896 }
  0xee   :  { %v899_v1 = vpop.eup %898  ;;  %v134_v3 = vrot.slane %v897_v0, 1 }
  0xef   :  { %v161_v5 = vrot.slane %v899_v1, 1 }
  0xf0   :  { %v136_v6 = vmul.f32 %v134_v3, %v132_v2 }
  0xf1   :  { %v163_v9 = vmul.f32 %v161_v5, %v159_v4 }
  0xf2   :  { %v138_v12 = vadd.f32 %v137_v7, %v136_v6 }
  0xf3   :  { %v1130_v15 = vadd.f32 %v164_v10, %v163_v9 }
  0xf4   :  { %v171_v16 = vrot.slane %v138_v12, %v1108_v31 }
  0xf5   :  { %v202_v17 = vrot.slane %v1130_v15, %v1108_v31 }
  0xf6   :  { %v172_v19 = vmul.f32 %v171_v16, %v1097_v11  ;;  %v197_v20 = vmul.f32 %v171_v16, %v1106_v26 }
  0xf7   :  { %v203_v23 = vmul.f32 %v202_v17, %v1110_v34  ;;  %v228_v24 = vmul.f32 %v202_v17, %v1128_v13 }
  0xf8   :  { %v173_v25 = vadd.f32 %v172_v19, %v1103_v14  ;;  %v198_v28 = vadd.f32 %v197_v20, %v1119_v41 }
  0xf9   :  { %v204_v29 = vadd.f32 %v203_v23, %v1121_v42  ;;  %v229_v30 = vadd.f32 %v228_v24, %v1146_v27 }
  0xfa   :  { %v174_v33 = vadd.f32 %v851_v22, %v173_v25  ;;  %v182_v48 = vrot.slane %v173_v25, 2 }
  0xfb   :  { %v205_v35 = vadd.f32 %v204_v29, %v198_v28  ;;  %v232_v36 = vadd.f32 %v231_v32, %v229_v30  ;;  %v213_v50 = vrot.slane %v204_v29, 2  ;;  %v855_v29 = vld [vmem:[%s1322_s0 + $0xc] sm:$0x7] }
  0xfc   :  { %v852_v37 = vmul.f32 -1.442695, %v174_v33 }
  0xfd   :  { %v853_v38 = vmul.f32 -1.442695, %v205_v35  ;;  %v854_v39 = vmul.f32 -1.442695, %v232_v36 }
  0xfe   :  { %900 = vpow2.f32 %v852_v37 }
  0xff   :  { %902 = vpow2.f32 %v853_v38 }
 0x100   :  { %904 = vpow2.f32 %v854_v39 }
 0x108   :  { %v901_v40 = vpop.eup %900 }
 0x109   :  { %v903_v43 = vpop.eup %902  ;;  %v178_v44 = vadd.f32 1.0, %v901_v40 }
 0x10a   :  { %v905_v45 = vpop.eup %904  ;;  %v209_v46 = vadd.f32 1.0, %v903_v43 }
 0x10b   :  { %906 = vrcp.f32 %v178_v44  ;;  %v236_v47 = vadd.f32 1.0, %v905_v45 }
 0x10c   :  { %908 = vrcp.f32 %v209_v46 }
 0x10d   :  { %910 = vrcp.f32 %v236_v47 }
 0x115   :  { %v907_v49 = vpop.eup %906 }
 0x116   :  { %v909_v51 = vpop.eup %908  ;;  %v184_v52 = vmul.f32 %v907_v49, %v182_v48  ;;  %v190_v1 = vsub.f32 1.0, %v907_v49  ;;  %v195_v7 = vmul.f32 %v907_v49, %v138_v12 }
 0x117   :  { %v911_v54 = vpop.eup %910  ;;  %v215_v55 = vmul.f32 %v909_v51, %v213_v50  ;;  %v221_v4 = vsub.f32 1.0, %v909_v51  ;;  %v226_v17 = vmul.f32 %v909_v51, %v1130_v15 }
 0x118   :  { %v186_v56 = vrot.slane %v184_v52, 6  ;;  %v242_v57 = vmul.f32 %v911_v54, %v240_v53  ;;  %v248_v9 = vsub.f32 1.0, %v911_v54  ;;  %v253_v20 = vmul.f32 0.0, %v911_v54 }
 0x119   :  { %v217_v58 = vrot.slane %v215_v55, 6 }
 0x11a   :  { %v188_v59 = vadd.f32 %v851_v22, %v186_v56  ;;  %v244_v60 = vrot.slane %v242_v57, 6 }
 0x11b   :  { %v219_v61 = vadd.f32 %v217_v58, %v198_v28 }
 0x11c   :  { %912 = vtanh.f32 %v188_v59  ;;  %v246_v62 = vadd.f32 %v244_v60, %v229_v30 }
 0x11d   :  { %914 = vtanh.f32 %v219_v61 }
 0x11e   :  { %916 = vtanh.f32 %v246_v62 }
 0x126   :  { %v913_v63 = vpop.eup %912 }
 0x127   :  { %v915_v0 = vpop.eup %914  ;;  %v192_v2 = vrot.slane %v913_v63, 1 }
 0x128   :  { %v917_v3 = vpop.eup %916  ;;  %v223_v5 = vrot.slane %v915_v0, 1 }
 0x129   :  { %v194_v6 = vmul.f32 %v192_v2, %v190_v1  ;;  %v250_v10 = vrot.slane %v917_v3, 1 }
 0x12a   :  { %v225_v16 = vmul.f32 %v223_v5, %v221_v4 }
 0x12b   :  { %v1153_v18 = vadd.f32 %v195_v7, %v194_v6  ;;  %v252_v19 = vmul.f32 %v250_v10, %v248_v9 }
 0x12c   :  { %v1155_v22 = vadd.f32 %v226_v17, %v225_v16 }
 0x12d   :  { %v260_v23 = vrot.slane %v1153_v18, %v1108_v31  ;;  %v1159_v24 = vadd.f32 %v253_v20, %v252_v19 }
 0x12e   :  { %v291_v25 = vrot.slane %v1155_v22, %v1108_v31 }
 0x12f   :  { %v261_v12 = vmul.f32 %v260_v23, %v1097_v11  ;;  %v286_v28 = vmul.f32 %v260_v23, %v1106_v26  ;;  %v322_v15 = vrot.slane %v1159_v24, %v1108_v31 }
 0x130   :  { %v292_v30 = vmul.f32 %v291_v25, %v1110_v34  ;;  %v317_v32 = vmul.f32 %v291_v25, %v1128_v13 }
 0x131   :  { %v262_v33 = vadd.f32 %v261_v12, %v1103_v14  ;;  %v287_v35 = vadd.f32 %v286_v28, %v1119_v41  ;;  %v323_v36 = vmul.f32 %v322_v15, %v1126_v8 }
 0x132   :  { %v293_v37 = vadd.f32 %v292_v30, %v1121_v42  ;;  %v318_v38 = vadd.f32 %v317_v32, %v1146_v27 }
 0x133   :  { %v263_v39 = vadd.f32 %v855_v29, %v262_v33  ;;  %v324_v40 = vadd.f32 %v323_v36, %v1138_v21  ;;  %v271_v54 = vrot.slane %v262_v33, 2 }
 0x134   :  { %v294_v43 = vadd.f32 %v293_v37, %v287_v35  ;;  %v302_v56 = vrot.slane %v293_v37, 2 }
 0x135   :  { %v856_v44 = vmul.f32 -1.442695, %v263_v39  ;;  %v325_v45 = vadd.f32 %v324_v40, %v318_v38  ;;  %v333_v59 = vrot.slane %v324_v40, 2 }
 0x136   :  { %v857_v46 = vmul.f32 -1.442695, %v294_v43 }
 0x137   :  { %918 = vpow2.f32 %v856_v44  ;;  %v858_v47 = vmul.f32 -1.442695, %v325_v45 }
 0x138   :  { %920 = vpow2.f32 %v857_v46 }
 0x139   :  { %922 = vpow2.f32 %v858_v47 }
 0x141   :  { %v919_v48 = vpop.eup %918 }
 0x142   :  { %v921_v49 = vpop.eup %920  ;;  %v267_v50 = vadd.f32 1.0, %v919_v48 }
 0x143   :  { %v923_v51 = vpop.eup %922  ;;  %v298_v52 = vadd.f32 1.0, %v921_v49 }
 0x144   :  { %924 = vrcp.f32 %v267_v50  ;;  %v329_v53 = vadd.f32 1.0, %v923_v51 }
 0x145   :  { %926 = vrcp.f32 %v298_v52 }
 0x146   :  { %928 = vrcp.f32 %v329_v53 }
 0x14e   :  { %v925_v55 = vpop.eup %924 }
 0x14f   :  { %v927_v57 = vpop.eup %926  ;;  %v273_v58 = vmul.f32 %v925_v55, %v271_v54  ;;  %v279_v7 = vsub.f32 1.0, %v925_v55  ;;  %v284_v20 = vmul.f32 %v925_v55, %v1153_v18 }
 0x150   :  { %v929_v60 = vpop.eup %928  ;;  %v304_v61 = vmul.f32 %v927_v57, %v302_v56  ;;  %v310_v16 = vsub.f32 1.0, %v927_v57  ;;  %v315_v28 = vmul.f32 %v927_v57, %v1155_v22 }
 0x151   :  { %v275_v62 = vrot.slane %v273_v58, 6  ;;  %v335_v63 = vmul.f32 %v929_v60, %v333_v59  ;;  %v341_v23 = vsub.f32 1.0, %v929_v60  ;;  %v346_v30 = vmul.f32 %v929_v60, %v1159_v24  ;;  %v859_v24 = vld [vmem:[%s1322_s0 + $0x10] sm:$0x7] }
 0x152   :  { %v306_v0 = vrot.slane %v304_v61, 6 }
 0x153   :  { %v277_v1 = vadd.f32 %v855_v29, %v275_v62  ;;  %v337_v2 = vrot.slane %v335_v63, 6 }
 0x154   :  { %v308_v3 = vadd.f32 %v306_v0, %v287_v35 }
 0x155   :  { %930 = vtanh.f32 %v277_v1  ;;  %v339_v4 = vadd.f32 %v337_v2, %v318_v38 }
 0x156   :  { %932 = vtanh.f32 %v308_v3 }
 0x157   :  { %934 = vtanh.f32 %v339_v4 }
 0x15f   :  { %v931_v5 = vpop.eup %930 }
 0x160   :  { %v933_v6 = vpop.eup %932  ;;  %v281_v9 = vrot.slane %v931_v5, 1 }
 0x161   :  { %v935_v10 = vpop.eup %934  ;;  %v312_v17 = vrot.slane %v933_v6, 1 }
 0x162   :  { %v283_v19 = vmul.f32 %v281_v9, %v279_v7  ;;  %v343_v25 = vrot.slane %v935_v10, 1 }
 0x163   :  { %v314_v12 = vmul.f32 %v312_v17, %v310_v16 }
 0x164   :  { %v1180_v15 = vadd.f32 %v284_v20, %v283_v19  ;;  %v345_v29 = vmul.f32 %v343_v25, %v341_v23 }
 0x165   :  { %v1183_v32 = vadd.f32 %v315_v28, %v314_v12 }
 0x166   :  { %v353_v33 = vrot.slane %v1180_v15, %v1108_v31  ;;  %v1187_v35 = vadd.f32 %v346_v30, %v345_v29 }
 0x167   :  { %v384_v18 = vrot.slane %v1183_v32, %v1108_v31 }
 0x168   :  { %v354_v36 = vmul.f32 %v353_v33, %v1097_v11  ;;  %v379_v37 = vmul.f32 %v353_v33, %v1106_v26  ;;  %v415_v22 = vrot.slane %v1187_v35, %v1108_v31 }
 0x169   :  { %v385_v38 = vmul.f32 %v384_v18, %v1110_v34  ;;  %v410_v39 = vmul.f32 %v384_v18, %v1128_v13 }
 0x16a   :  { %v355_v40 = vadd.f32 %v354_v36, %v1103_v14  ;;  %v380_v43 = vadd.f32 %v379_v37, %v1119_v41  ;;  %v416_v44 = vmul.f32 %v415_v22, %v1126_v8 }
 0x16b   :  { %v386_v45 = vadd.f32 %v385_v38, %v1121_v42  ;;  %v411_v46 = vadd.f32 %v410_v39, %v1146_v27 }
 0x16c   :  { %v356_v47 = vadd.f32 %v859_v24, %v355_v40  ;;  %v417_v48 = vadd.f32 %v416_v44, %v1138_v21  ;;  %v364_v60 = vrot.slane %v355_v40, 2 }
 0x16d   :  { %v387_v49 = vadd.f32 %v386_v45, %v380_v43  ;;  %v395_v62 = vrot.slane %v386_v45, 2 }
 0x16e   :  { %v860_v50 = vmul.f32 -1.442695, %v356_v47  ;;  %v418_v51 = vadd.f32 %v417_v48, %v411_v46  ;;  %v426_v1 = vrot.slane %v417_v48, 2 }
 0x16f   :  { %v861_v52 = vmul.f32 -1.442695, %v387_v49 }
 0x170   :  { %936 = vpow2.f32 %v860_v50  ;;  %v862_v53 = vmul.f32 -1.442695, %v418_v51 }
 0x171   :  { %938 = vpow2.f32 %v861_v52 }
 0x172   :  { %940 = vpow2.f32 %v862_v53 }
 0x17a   :  { %v937_v54 = vpop.eup %936 }
 0x17b   :  { %v939_v55 = vpop.eup %938  ;;  %v360_v56 = vadd.f32 1.0, %v937_v54 }
 0x17c   :  { %v941_v57 = vpop.eup %940  ;;  %v391_v58 = vadd.f32 1.0, %v939_v55 }
 0x17d   :  { %942 = vrcp.f32 %v360_v56  ;;  %v422_v59 = vadd.f32 1.0, %v941_v57 }
 0x17e   :  { %944 = vrcp.f32 %v391_v58 }
 0x17f   :  { %946 = vrcp.f32 %v422_v59 }
 0x187   :  { %v943_v61 = vpop.eup %942 }
 0x188   :  { %v945_v63 = vpop.eup %944  ;;  %v366_v0 = vmul.f32 %v943_v61, %v364_v60  ;;  %v372_v20 = vsub.f32 1.0, %v943_v61  ;;  %v377_v30 = vmul.f32 %v943_v61, %v1180_v15 }
 0x189   :  { %v947_v2 = vpop.eup %946  ;;  %v397_v3 = vmul.f32 %v945_v63, %v395_v62  ;;  %v403_v12 = vsub.f32 1.0, %v945_v63  ;;  %v408_v37 = vmul.f32 %v945_v63, %v1183_v32 }
 0x18a   :  { %v368_v4 = vrot.slane %v366_v0, 6  ;;  %v428_v5 = vmul.f32 %v947_v2, %v426_v1  ;;  %v434_v33 = vsub.f32 1.0, %v947_v2  ;;  %v439_v38 = vmul.f32 %v947_v2, %v1187_v35  ;;  %v863_v35 = vld [vmem:[%s1322_s0 + $0x14] sm:$0x7] }
 0x18b   :  { %v399_v6 = vrot.slane %v397_v3, 6 }
 0x18c   :  { %v370_v7 = vadd.f32 %v859_v24, %v368_v4  ;;  %v430_v9 = vrot.slane %v428_v5, 6 }
 0x18d   :  { %v401_v10 = vadd.f32 %v399_v6, %v380_v43 }
 0x18e   :  { %948 = vtanh.f32 %v370_v7  ;;  %v432_v16 = vadd.f32 %v430_v9, %v411_v46 }
 0x18f   :  { %950 = vtanh.f32 %v401_v10 }
 0x190   :  { %952 = vtanh.f32 %v432_v16 }
 0x198   :  { %v949_v17 = vpop.eup %948 }
 0x199   :  { %v951_v19 = vpop.eup %950  ;;  %v374_v23 = vrot.slane %v949_v17, 1 }
 0x19a   :  { %v953_v25 = vpop.eup %952  ;;  %v405_v28 = vrot.slane %v951_v19, 1 }
 0x19b   :  { %v376_v29 = vmul.f32 %v374_v23, %v372_v20  ;;  %v436_v18 = vrot.slane %v953_v25, 1 }
 0x19c   :  { %v407_v36 = vmul.f32 %v405_v28, %v403_v12 }
 0x19d   :  { %v1208_v22 = vadd.f32 %v377_v30, %v376_v29  ;;  %v438_v24 = vmul.f32 %v436_v18, %v434_v33 }
 0x19e   :  { %v1211_v39 = vadd.f32 %v408_v37, %v407_v36 }
 0x19f   :  { %v446_v40 = vrot.slane %v1208_v22, %v1108_v31  ;;  %v1215_v43 = vadd.f32 %v439_v38, %v438_v24 }
 0x1a0   :  { %v477_v15 = vrot.slane %v1211_v39, %v1108_v31 }
 0x1a1   :  { %v447_v44 = vmul.f32 %v446_v40, %v1097_v11  ;;  %v472_v45 = vmul.f32 %v446_v40, %v1106_v26  ;;  %v508_v32 = vrot.slane %v1215_v43, %v1108_v31 }
 0x1a2   :  { %v478_v46 = vmul.f32 %v477_v15, %v1110_v34  ;;  %v503_v47 = vmul.f32 %v477_v15, %v1128_v13 }
 0x1a3   :  { %v448_v48 = vadd.f32 %v447_v44, %v1103_v14  ;;  %v473_v49 = vadd.f32 %v472_v45, %v1119_v41  ;;  %v509_v50 = vmul.f32 %v508_v32, %v1126_v8 }
 0x1a4   :  { %v479_v51 = vadd.f32 %v478_v46, %v1121_v42  ;;  %v504_v52 = vadd.f32 %v503_v47, %v1146_v27 }
 0x1a5   :  { %v449_v53 = vadd.f32 %v863_v35, %v448_v48  ;;  %v510_v54 = vadd.f32 %v509_v50, %v1138_v21  ;;  %v457_v2 = vrot.slane %v448_v48, 2 }
 0x1a6   :  { %v480_v55 = vadd.f32 %v479_v51, %v473_v49  ;;  %v488_v4 = vrot.slane %v479_v51, 2 }
 0x1a7   :  { %v864_v56 = vmul.f32 -1.442695, %v449_v53  ;;  %v511_v57 = vadd.f32 %v510_v54, %v504_v52  ;;  %v519_v7 = vrot.slane %v510_v54, 2 }
 0x1a8   :  { %v865_v58 = vmul.f32 -1.442695, %v480_v55 }
 0x1a9   :  { %954 = vpow2.f32 %v864_v56  ;;  %v866_v59 = vmul.f32 -1.442695, %v511_v57 }
 0x1aa   :  { %956 = vpow2.f32 %v865_v58 }
 0x1ab   :  { %958 = vpow2.f32 %v866_v59 }
 0x1b3   :  { %v955_v60 = vpop.eup %954 }
 0x1b4   :  { %v957_v61 = vpop.eup %956  ;;  %v453_v62 = vadd.f32 1.0, %v955_v60 }
 0x1b5   :  { %v959_v63 = vpop.eup %958  ;;  %v484_v0 = vadd.f32 1.0, %v957_v61 }
 0x1b6   :  { %960 = vrcp.f32 %v453_v62  ;;  %v515_v1 = vadd.f32 1.0, %v959_v63 }
 0x1b7   :  { %962 = vrcp.f32 %v484_v0 }
 0x1b8   :  { %964 = vrcp.f32 %v515_v1 }
 0x1c0   :  { %v961_v3 = vpop.eup %960 }
 0x1c1   :  { %v963_v5 = vpop.eup %962  ;;  %v459_v6 = vmul.f32 %v961_v3, %v457_v2  ;;  %v465_v30 = vsub.f32 1.0, %v961_v3  ;;  %v470_v38 = vmul.f32 %v961_v3, %v1208_v22 }
 0x1c2   :  { %v965_v9 = vpop.eup %964  ;;  %v490_v10 = vmul.f32 %v963_v5, %v488_v4  ;;  %v496_v36 = vsub.f32 1.0, %v963_v5  ;;  %v501_v45 = vmul.f32 %v963_v5, %v1211_v39 }
 0x1c3   :  { %v461_v16 = vrot.slane %v459_v6, 6  ;;  %v521_v17 = vmul.f32 %v965_v9, %v519_v7  ;;  %v527_v40 = vsub.f32 1.0, %v965_v9  ;;  %v532_v46 = vmul.f32 %v965_v9, %v1215_v43  ;;  %v867_v43 = vld [vmem:[%s1322_s0 + $0x18] sm:$0x7] }
 0x1c4   :  { %v492_v19 = vrot.slane %v490_v10, 6 }
 0x1c5   :  { %v463_v20 = vadd.f32 %v863_v35, %v461_v16  ;;  %v523_v23 = vrot.slane %v521_v17, 6 }
 0x1c6   :  { %v494_v25 = vadd.f32 %v492_v19, %v473_v49 }
 0x1c7   :  { %966 = vtanh.f32 %v463_v20  ;;  %v525_v12 = vadd.f32 %v523_v23, %v504_v52 }
 0x1c8   :  { %968 = vtanh.f32 %v494_v25 }
 0x1c9   :  { %970 = vtanh.f32 %v525_v12 }
 0x1d1   :  { %v967_v28 = vpop.eup %966 }
 0x1d2   :  { %v969_v29 = vpop.eup %968  ;;  %v467_v33 = vrot.slane %v967_v28, 1 }
 0x1d3   :  { %v971_v18 = vpop.eup %970  ;;  %v498_v37 = vrot.slane %v969_v29, 1 }
 0x1d4   :  { %v469_v24 = vmul.f32 %v467_v33, %v465_v30  ;;  %v529_v15 = vrot.slane %v971_v18, 1 }
 0x1d5   :  { %v500_v44 = vmul.f32 %v498_v37, %v496_v36 }
 0x1d6   :  { %v1236_v32 = vadd.f32 %v470_v38, %v469_v24  ;;  %v531_v35 = vmul.f32 %v529_v15, %v527_v40 }
 0x1d7   :  { %v1239_v47 = vadd.f32 %v501_v45, %v500_v44 }
 0x1d8   :  { %v539_v48 = vrot.slane %v1236_v32, %v1108_v31  ;;  %v1243_v49 = vadd.f32 %v532_v46, %v531_v35 }
 0x1d9   :  { %v570_v22 = vrot.slane %v1239_v47, %v1108_v31 }
 0x1da   :  { %v540_v50 = vmul.f32 %v539_v48, %v1097_v11  ;;  %v565_v51 = vmul.f32 %v539_v48, %v1106_v26  ;;  %v601_v39 = vrot.slane %v1243_v49, %v1108_v31 }
 0x1db   :  { %v571_v52 = vmul.f32 %v570_v22, %v1110_v34  ;;  %v596_v53 = vmul.f32 %v570_v22, %v1128_v13 }
 0x1dc   :  { %v541_v54 = vadd.f32 %v540_v50, %v1103_v14  ;;  %v566_v55 = vadd.f32 %v565_v51, %v1119_v41  ;;  %v602_v56 = vmul.f32 %v601_v39, %v1126_v8 }
 0x1dd   :  { %v572_v57 = vadd.f32 %v571_v52, %v1121_v42  ;;  %v597_v58 = vadd.f32 %v596_v53, %v1146_v27 }
 0x1de   :  { %v542_v59 = vadd.f32 %v867_v43, %v541_v54  ;;  %v603_v60 = vadd.f32 %v602_v56, %v1138_v21  ;;  %v550_v9 = vrot.slane %v541_v54, 2 }
 0x1df   :  { %v573_v61 = vadd.f32 %v572_v57, %v566_v55  ;;  %v581_v16 = vrot.slane %v572_v57, 2 }
 0x1e0   :  { %v868_v62 = vmul.f32 -1.442695, %v542_v59  ;;  %v604_v63 = vadd.f32 %v603_v60, %v597_v58  ;;  %v612_v20 = vrot.slane %v603_v60, 2 }
 0x1e1   :  { %v869_v0 = vmul.f32 -1.442695, %v573_v61 }
 0x1e2   :  { %972 = vpow2.f32 %v868_v62  ;;  %v870_v1 = vmul.f32 -1.442695, %v604_v63 }
 0x1e3   :  { %974 = vpow2.f32 %v869_v0 }
 0x1e4   :  { %976 = vpow2.f32 %v870_v1 }
 0x1ec   :  { %v973_v2 = vpop.eup %972 }
 0x1ed   :  { %v975_v3 = vpop.eup %974  ;;  %v546_v4 = vadd.f32 1.0, %v973_v2 }
 0x1ee   :  { %v977_v5 = vpop.eup %976  ;;  %v577_v6 = vadd.f32 1.0, %v975_v3 }
 0x1ef   :  { %978 = vrcp.f32 %v546_v4  ;;  %v608_v7 = vadd.f32 1.0, %v977_v5 }
 0x1f0   :  { %980 = vrcp.f32 %v577_v6 }
 0x1f1   :  { %982 = vrcp.f32 %v608_v7 }
 0x1f9   :  { %v979_v10 = vpop.eup %978 }
 0x1fa   :  { %v981_v17 = vpop.eup %980  ;;  %v552_v19 = vmul.f32 %v979_v10, %v550_v9  ;;  %v558_v38 = vsub.f32 1.0, %v979_v10  ;;  %v563_v46 = vmul.f32 %v979_v10, %v1236_v32 }
 0x1fb   :  { %v983_v23 = vpop.eup %982  ;;  %v583_v25 = vmul.f32 %v981_v17, %v581_v16  ;;  %v589_v44 = vsub.f32 1.0, %v981_v17  ;;  %v594_v51 = vmul.f32 %v981_v17, %v1239_v47 }
 0x1fc   :  { %v554_v12 = vrot.slane %v552_v19, 6  ;;  %v614_v28 = vmul.f32 %v983_v23, %v612_v20  ;;  %v620_v48 = vsub.f32 1.0, %v983_v23  ;;  %v625_v52 = vmul.f32 %v983_v23, %v1243_v49  ;;  %v871_v49 = vld [vmem:[%s1322_s0 + $0x1c] sm:$0x7]  ;;  %s1051_s0 = smov [#allocation2]  }
 0x1fd   :  { %v585_v29 = vrot.slane %v583_v25, 6  ;;  %s829_s16 = sshll.u32 %s1051_s0, 4  ;;  %s830_s16 = int_to_ptr.vmem [resolvable:$true] %s829_s16 }
 0x1fe   :  { %v556_v30 = vadd.f32 %v867_v43, %v554_v12  ;;  %v616_v33 = vrot.slane %v614_v28, 6  ;;  %s1026_s17 = scalar_lea.vmem %s830_s16, 16  ;;  %s1030_s18 = scalar_lea.vmem %s830_s16, 32 }
 0x1ff   :  { %v587_v18 = vadd.f32 %v585_v29, %v566_v55  ;;  %p1027_p0 = scmp.ne.s32.totalorder %s830_s16, %s1026_s17  ;;  %p1031_p1 = scmp.lt.s32.totalorder %s830_s16, %s830_s16 }
 0x200   :  { %984 = vtanh.f32 %v556_v30  ;;  %v618_v36 = vadd.f32 %v616_v33, %v597_v58  ;;  %p1032_p2 = scmp.lt.s32.totalorder %s1030_s18, %s1026_s17 }
 0x201   :  { %986 = vtanh.f32 %v587_v18 }
 0x202   :  { %988 = vtanh.f32 %v618_v36  ;;  %p1033_p3 = por %p1032_p2, %p1031_p1 }
 0x204   :  { %p1034_p4 = pnand %p1033_p3, %p1027_p0 }
 0x20a   :  { %v985_v37 = vpop.eup %984 }
 0x20b   :  { %v987_v24 = vpop.eup %986  ;;  %v560_v40 = vrot.slane %v985_v37, 1 }
 0x20c   :  { %v989_v15 = vpop.eup %988  ;;  %v591_v45 = vrot.slane %v987_v24, 1 }
 0x20d   :  { %v562_v35 = vmul.f32 %v560_v40, %v558_v38  ;;  %v622_v22 = vrot.slane %v989_v15, 1 }
 0x20e   :  { %v593_v50 = vmul.f32 %v591_v45, %v589_v44 }
 0x20f   :  { %v1264_v39 = vadd.f32 %v563_v46, %v562_v35  ;;  %v624_v43 = vmul.f32 %v622_v22, %v620_v48 }
 0x210   :  { %v1267_v53 = vadd.f32 %v594_v51, %v593_v50 }
 0x211   :  { %v632_v54 = vrot.slane %v1264_v39, %v1108_v31  ;;  %v1271_v55 = vadd.f32 %v625_v52, %v624_v43 }
 0x212   :  { %v663_v32 = vrot.slane %v1267_v53, %v1108_v31 }
 0x213   :  { %v633_v56 = vmul.f32 %v632_v54, %v1097_v11  ;;  %v658_v57 = vmul.f32 %v632_v54, %v1106_v26  ;;  %v694_v47 = vrot.slane %v1271_v55, %v1108_v31 }
 0x214   :  { %v664_v58 = vmul.f32 %v663_v32, %v1110_v34  ;;  %v689_v59 = vmul.f32 %v663_v32, %v1128_v13 }
 0x215   :  { %v634_v60 = vadd.f32 %v633_v56, %v1103_v14  ;;  %v659_v61 = vadd.f32 %v658_v57, %v1119_v41  ;;  %v695_v62 = vmul.f32 %v694_v47, %v1126_v8 }
 0x216   :  { %v665_v11 = vadd.f32 %v664_v58, %v1121_v42  ;;  %v690_v63 = vadd.f32 %v689_v59, %v1146_v27 }
 0x217   :  { %v635_v0 = vadd.f32 %v871_v49, %v634_v60  ;;  %v696_v1 = vadd.f32 %v695_v62, %v1138_v21  ;;  %v643_v19 = vrot.slane %v634_v60, 2 }
 0x218   :  { %v666_v2 = vadd.f32 %v665_v11, %v659_v61  ;;  %v674_v23 = vrot.slane %v665_v11, 2 }
 0x219   :  { %v872_v3 = vmul.f32 -1.442695, %v635_v0  ;;  %v697_v4 = vadd.f32 %v696_v1, %v690_v63  ;;  %v705_v28 = vrot.slane %v696_v1, 2 }
 0x21a   :  { %v873_v5 = vmul.f32 -1.442695, %v666_v2 }
 0x21b   :  { %990 = vpow2.f32 %v872_v3  ;;  %v874_v6 = vmul.f32 -1.442695, %v697_v4 }
 0x21c   :  { %992 = vpow2.f32 %v873_v5 }
 0x21d   :  { %994 = vpow2.f32 %v874_v6 }
 0x225   :  { %v991_v14 = vpop.eup %990 }
 0x226   :  { %v993_v7 = vpop.eup %992  ;;  %v639_v9 = vadd.f32 1.0, %v991_v14 }
 0x227   :  { %v995_v10 = vpop.eup %994  ;;  %v670_v16 = vadd.f32 1.0, %v993_v7 }
 0x228   :  { %996 = vrcp.f32 %v639_v9  ;;  %v701_v17 = vadd.f32 1.0, %v995_v10 }
 0x229   :  { %998 = vrcp.f32 %v670_v16 }
 0x22a   :  { %1000 = vrcp.f32 %v701_v17 }
 0x232   :  { %v997_v20 = vpop.eup %996 }
 0x233   :  { %v999_v25 = vpop.eup %998  ;;  %v645_v12 = vmul.f32 %v997_v20, %v643_v19  ;;  %v651_v35 = vsub.f32 1.0, %v997_v20  ;;  %v656_v51 = vmul.f32 %v997_v20, %v1264_v39 }
 0x234   :  { %v1001_v29 = vpop.eup %1000  ;;  %v676_v30 = vmul.f32 %v999_v25, %v674_v23  ;;  %v682_v48 = vsub.f32 1.0, %v999_v25  ;;  %v687_v32 = vmul.f32 %v999_v25, %v1267_v53 }
 0x235   :  { %v647_v33 = vrot.slane %v645_v12, 6  ;;  %v707_v18 = vmul.f32 %v1001_v29, %v705_v28  ;;  %v713_v43 = vsub.f32 1.0, %v1001_v29  ;;  %v718_v47 = vmul.f32 %v1001_v29, %v1271_v55 }
 0x236   :  { %v678_v36 = vrot.slane %v676_v30, 6 }
 0x237   :  { %v649_v37 = vadd.f32 %v871_v49, %v647_v33  ;;  %v709_v24 = vrot.slane %v707_v18, 6 }
 0x238   :  { %v680_v38 = vadd.f32 %v678_v36, %v659_v61 }
 0x239   :  { %1002 = vtanh.f32 %v649_v37  ;;  %v711_v40 = vadd.f32 %v709_v24, %v690_v63 }
 0x23a   :  { %1004 = vtanh.f32 %v680_v38 }
 0x23b   :  { %1006 = vtanh.f32 %v711_v40 }
 0x243   :  { %v1003_v15 = vpop.eup %1002 }
 0x244   :  { %v1005_v44 = vpop.eup %1004  ;;  %v653_v45 = vrot.slane %v1003_v15, 1 }
 0x245   :  { %v1007_v46 = vpop.eup %1006  ;;  %v684_v22 = vrot.slane %v1005_v44, 1 }
 0x246   :  { %v655_v50 = vmul.f32 %v653_v45, %v651_v35  ;;  %v715_v52 = vrot.slane %v1007_v46, 1 }
 0x247   :  { %v686_v54 = vmul.f32 %v684_v22, %v682_v48 }
 0x248   :  { %v657_v56 = vadd.f32 %v656_v51, %v655_v50  ;;  %v717_v57 = vmul.f32 %v715_v52, %v713_v43 }
 0x249   :  { %v688_v49 = vadd.f32 %v687_v32, %v686_v54 }
 0x24a   :  { %v723_v58 = vrot.slane %v657_v56, %v1108_v31  ;;  %v719_v59 = vadd.f32 %v718_v47, %v717_v57 }
 0x24b   :  { %v729_v60 = vrot.slane %v688_v49, %v1108_v31 }
 0x24c   :  { %v724_v61 = vmul.f32 %v723_v58, %v1106_v26  ;;  %v760_v62 = vrot.slane %v719_v59, %v1108_v31 }
 0x24d   :  { %v730_v39 = vmul.f32 %v729_v60, %v1110_v34  ;;  %v755_v11 = vmul.f32 %v729_v60, %v1128_v13 }
 0x24e   :  { %v725_v53 = vadd.f32 %v724_v61, %v1119_v41  ;;  %v761_v63 = vmul.f32 %v760_v62, %v1126_v8 }
 0x24f   :  { %v731_v55 = vadd.f32 %v730_v39, %v1121_v42  ;;  %v756_v0 = vadd.f32 %v755_v11, %v1146_v27 }
 0x250   :  { %v762_v1 = vadd.f32 %v761_v63, %v1138_v21 }
 0x251   :  { %v732_v2 = vadd.f32 %v731_v55, %v725_v53  ;;  %v740_v41 = vrot.slane %v731_v55, 2 }
 0x252   :  { %v763_v3 = vadd.f32 %v762_v1, %v756_v0  ;;  %v771_v9 = vrot.slane %v762_v1, 2 }
 0x253   :  { %v875_v4 = vmul.f32 -1.442695, %v732_v2 }
 0x254   :  { %v876_v26 = vmul.f32 -1.442695, %v763_v3 }
 0x255   :  { %1008 = vpow2.f32 %v875_v4 }
 0x256   :  { %1010 = vpow2.f32 %v876_v26 }
 0x25f   :  { %v1009_v5 = vpop.eup %1008 }
 0x260   :  { %v1011_v34 = vpop.eup %1010  ;;  %v736_v6 = vadd.f32 1.0, %v1009_v5 }
 0x261   :  { %v767_v14 = vadd.f32 1.0, %v1011_v34 }
 0x262   :  { %1012 = vrcp.f32 %v736_v6 }
 0x263   :  { %1014 = vrcp.f32 %v767_v14 }
 0x26c   :  { %v1013_v7 = vpop.eup %1012 }
 0x26d   :  { %v1015_v42 = vpop.eup %1014  ;;  %v742_v10 = vmul.f32 %v1013_v7, %v740_v41  ;;  %v748_v28 = vsub.f32 1.0, %v1013_v7  ;;  %v753_v36 = vmul.f32 %v1013_v7, %v688_v49 }
 0x26e   :  { %v773_v16 = vmul.f32 %v1015_v42, %v771_v9  ;;  %v779_v30 = vsub.f32 1.0, %v1015_v42  ;;  %v784_v24 = vmul.f32 %v1015_v42, %v719_v59 }
 0x26f   :  { %v744_v17 = vrot.slane %v742_v10, 6 }
 0x270   :  { %v775_v19 = vrot.slane %v773_v16, 6 }
 0x271   :  { %v746_v20 = vadd.f32 %v744_v17, %v725_v53 }
 0x272   :  { %v777_v23 = vadd.f32 %v775_v19, %v756_v0 }
 0x273   :  { %1016 = vtanh.f32 %v746_v20 }
 0x274   :  { %1018 = vtanh.f32 %v777_v23 }
 0x27d   :  { %v1017_v25 = vpop.eup %1016 }
 0x27e   :  { %v1019_v12 = vpop.eup %1018  ;;  %v750_v29 = vrot.slane %v1017_v25, 1 }
 0x27f   :  { %v781_v33 = vrot.slane %v1019_v12, 1 }
 0x280   :  { %v752_v18 = vmul.f32 %v750_v29, %v748_v28 }
 0x281   :  { %v783_v37 = vmul.f32 %v781_v33, %v779_v30 }
 0x282   :  { %v754_v38 = vadd.f32 %v753_v36, %v752_v18 }
 0x283   :  { %v785_v40 = vadd.f32 %v784_v24, %v783_v37 }
 0x284   :  { %v789_v15 = vrot.slane %v754_v38, %v1108_v31 }
 0x285   :  { %v795_v44 = vrot.slane %v785_v40, %v1108_v31 }
 0x286   :  { %v790_v45 = vmul.f32 %v789_v15, %v1128_v13 }
 0x287   :  { %v796_v35 = vmul.f32 %v795_v44, %v1126_v8 }
 0x288   :  { %v791_v46 = vadd.f32 %v790_v45, %v1146_v27 }
 0x289   :  { %v797_v48 = vadd.f32 %v796_v35, %v1138_v21 }
 0x28b   :  { %v798_v22 = vadd.f32 %v797_v48, %v791_v46  ;;  %v806_v52 = vrot.slane %v797_v48, 2 }
 0x28d   :  { %v877_v50 = vmul.f32 -1.442695, %v798_v22 }
 0x28f   :  { %1020 = vpow2.f32 %v877_v50 }
 0x299   :  { %v1021_v51 = vpop.eup %1020 }
 0x29a   :  { %v802_v43 = vadd.f32 1.0, %v1021_v51 }
 0x29c   :  { %1022 = vrcp.f32 %v802_v43 }
 0x2a6   :  { %v1023_v54 = vpop.eup %1022 }
 0x2a7   :  { %v808_v32 = vmul.f32 %v1023_v54, %v806_v52  ;;  %v814_v13 = vsub.f32 1.0, %v1023_v54  ;;  %v819_v27 = vmul.f32 %v1023_v54, %v785_v40 }
 0x2a9   :  { %v810_v56 = vrot.slane %v808_v32, 6 }
 0x2ab   :  { %v812_v57 = vadd.f32 %v810_v56, %v791_v46 }
 0x2ad   :  { %1024 = vtanh.f32 %v812_v57 }
 0x2b7   :  { %v1025_v31 = vpop.eup %1024 }
 0x2b8   :  { %v816_v47 = vrot.slane %v1025_v31, 1 }
 0x2ba   :  { %v818_v8 = vmul.f32 %v816_v47, %v814_v13 }
 0x2bc   :  { %v820_v21 = vadd.f32 %v819_v27, %v818_v8 }
 0x2be   :  { %822 = vst.msk [vmem:[#allocation2 - $0x1] sm:$0x2] %vm821_vm0, %v820_v21 }
 0x2bf   :  { %1037 = shalt.err (!%p1034_p4)
}
 0x2c0   :  { %s1038_s21 = scalar_lea.hbm %s1324_s2, 16 }
 0x2c1   :  { %p1039_p5 = scmp.ne.s32.totalorder %s1324_s2, %s1038_s21  ;;  %p1042_p6 = scmp.lt.u32.totalorder %s1038_s21, %s1324_s2 }
 0x2c3   :  { %p1044_p7 = pnand %p1042_p6, %p1039_p5 }
 0x2c5   :  { %1047 = shalt.err (!%p1044_p7)
}
 0x2c6   :  { %832 = dma.vmem_to_hbm [thread:$0]  %s830_s16, 16, %s1324_s2, [#allocation3]  }
 0x2c7   :  { %1048 = dma.done.wait [#allocation3], 16  }
 0x2c8   :  { %1049 = vsyncadd [#allocation3], 4294967280 }
 0x2c9   :  { %836 = vsyncpa [#allocation3], 1 }

</bundles_post_ra>
